<compile_context>
chip_gen: v7x
topology: tpu7x:2x2x1
jax: 0.10.0
libtpu: 0.0.40
codegen_flags: <defaults>
</compile_context>

<pallas_src>
import jax
import jax.numpy as jnp
import numpy as np
from jax.experimental import pallas as pl
from jax.experimental.pallas import tpu as pltpu  # noqa: F401  (imported for completeness)


# ------------------------------ fused forward kernel -------------------------------
def _make_fused_kernel(T, H, B):
    H4 = 4 * H

    def kernel(x_ref, wx0_ref, b0_ref, w_wave_ref, b1_ref, fcw_ref, fcb_ref, out_ref):
        cdt = wx0_ref.dtype  # matmul-operand dtype: f32, or bf16 on the low-precision path

        # ---- Layer-0 input projections for ALL timesteps: ONE matmul, bias fused. ----
        # x_ref is the time-major (T*B, D) slab; per-step rows are contiguous.
        xp0 = (
            jnp.dot(x_ref[...].astype(cdt), wx0_ref[...], preferred_element_type=jnp.float32)
            + b0_ref[...]
        )  # (T*B, 4H), f32

        w_wave = w_wave_ref[...]                      # (2H, 8H) = [[Wh0, Wx1], [0, Wh1]]
        b1 = jnp.broadcast_to(b1_ref[...], (B, H4))   # hoisted (broadcasts aren't CSE'd in loops)

        def cell(gates, c):
            # Gate columns are [i | f | o | g]; g-columns were pre-scaled by 2 so
            # tanh(z_g) = 2*sigmoid(2*z_g) - 1  ->  one full-width sigmoid + a VPU fma.
            s = jax.nn.sigmoid(gates)
            i = s[:, 0 * H:1 * H]
            f = s[:, 1 * H:2 * H]
            o = s[:, 2 * H:3 * H]
            g = 2.0 * s[:, 3 * H:4 * H] - 1.0
            c_new = f * c + i * g
            h_new = o * jnp.tanh(c_new)
            return h_new, c_new

        zeros = jnp.zeros((B, H), jnp.float32)

        # Wave 0: layer-0 cell 0 only (h0 = c0 = 0 => recurrent matmul contributes nothing).
        h0, c0 = cell(xp0[0:B], zeros)
        h1, c1 = zeros, zeros

        # Waves 1..T-1: layer-0 cell w and layer-1 cell w-1, one fused MXU push per wave:
        #   [h0 | h1] @ [[Wh0, Wx1], [0, Wh1]]
        # covers layer-0 recurrence, layer-1 input projection, and layer-1 recurrence.
        for w in range(1, T):
            hcat = jnp.concatenate([h0, h1], axis=1).astype(cdt)               # (B, 2H)
            proj = jnp.dot(hcat, w_wave, preferred_element_type=jnp.float32)   # (B, 8H)
            gates0 = xp0[w * B:(w + 1) * B] + proj[:, :H4]
            gates1 = b1 + proj[:, H4:]
            h0, c0 = cell(gates0, c0)   # layer-0 cell w
            h1, c1 = cell(gates1, c1)   # layer-1 cell w-1 (independent of the new h0)

        # Wave T: layer-1 cell T-1 only (right half of the fused weight).
        hcat = jnp.concatenate([h0, h1], axis=1).astype(cdt)
        proj = jnp.dot(hcat, w_wave[:, H4:], preferred_element_type=jnp.float32)
        h1, c1 = cell(b1 + proj, c1)

        # Classifier head on the final top-layer hidden state (kept f32, off the chain).
        out_ref[...] = (
            jnp.dot(h1, fcw_ref[...], preferred_element_type=jnp.float32) + fcb_ref[...]
        )

    return kernel


@jax.jit
def model_forward(x, prep):
    """x: (B, T, input_size) batch-first, same as the PyTorch module.  prep: prepared params."""
    B, T, D = x.shape
    H = prep["w_wave"].shape[0] // 2
    C = prep["fc_w_t"].shape[1]

    # Time-major (T*B, D) slab for the single batched layer-0 input projection
    # (512 B of data; cheaper and more robust than exotic in-kernel indexing).
    x_tm = jnp.transpose(x, (1, 0, 2)).reshape(T * B, D).astype(jnp.float32)

    kernel = _make_fused_kernel(T, H, B)
    return pl.pallas_call(
        kernel,
        out_shape=jax.ShapeDtypeStruct((B, C), jnp.float32),
    )(x_tm, prep["wx0"], prep["b0"], prep["w_wave"], prep["b1"],
      prep["fc_w_t"], prep["fc_b"])


# --------------------------- parameter construction / prep --------------------------
def init_params(key, input_size, hidden_size, num_layers, num_classes):
    """Deterministic uniform(-1/sqrt(H), 1/sqrt(H)) init, same scheme as nn.LSTM (gates i,f,g,o)."""
    bound = 1.0 / np.sqrt(hidden_size)
    params = {"lstm": []}
    for l in range(num_layers):
        d_in = input_size if l == 0 else hidden_size
        key, k1, k2, k3, k4 = jax.random.split(key, 5)
        params["lstm"].append({
            "w_ih": jax.random.uniform(k1, (4 * hidden_size, d_in), jnp.float32, -bound, bound),
            "w_hh": jax.random.uniform(k2, (4 * hidden_size, hidden_size), jnp.float32, -bound, bound),
            "b_ih": jax.random.uniform(k3, (4 * hidden_size,), jnp.float32, -bound, bound),
            "b_hh": jax.random.uniform(k4, (4 * hidden_size,), jnp.float32, -bound, bound),
        })
    key, k5, k6 = jax.random.split(key, 3)
    params["fc_w"] = jax.random.uniform(k5, (num_classes, hidden_size), jnp.float32, -bound, bound)
    params["fc_b"] = jax.random.uniform(k6, (num_classes,), jnp.float32, -bound, bound)
    return params


def prepare_params(params, compute_dtype=jnp.float32):
    """One-time prep outside the hot path:
       * transpose weights to (D_in, 4H)/(H, 4H), pre-sum biases,
       * reorder gate columns [i, f, g, o] -> [i, f, o, g],
       * pre-scale g-gate columns by 2 (tanh-via-sigmoid trick),
       * build the fused per-wave weight W_wave = [[Wh0, Wx1], [0, Wh1]]  (2H, 8H),
       * optionally cast matmul operands to bfloat16 (single-pass MXU, esp. v5e).
    """
    assert len(params["lstm"]) == 2, "wavefront / block-diagonal fusion is specialized to num_layers=2"
    H = params["lstm"][0]["w_hh"].shape[1]
    perm = np.concatenate([np.arange(0, 2 * H), np.arange(3 * H, 4 * H), np.arange(2 * H, 3 * H)])
    gate_scale = jnp.concatenate(
        [jnp.ones((3 * H,), jnp.float32), jnp.full((H,), 2.0, jnp.float32)])

    prepped = []
    for layer in params["lstm"]:
        wx = jnp.asarray(layer["w_ih"])[perm].T * gate_scale                      # (D_in, 4H)
        wh = jnp.asarray(layer["w_hh"])[perm].T * gate_scale                      # (H, 4H)
        b = (jnp.asarray(layer["b_ih"] + layer["b_hh"])[perm] * gate_scale)[None, :]  # (1, 4H)
        prepped.append((wx, wh, b))
    (wx0, wh0, b0), (wx1, wh1, b1) = prepped

    w_wave = jnp.concatenate(
        [jnp.concatenate([wh0, wx1], axis=1),
         jnp.concatenate([jnp.zeros((H, 4 * H), jnp.float32), wh1], axis=1)],
        axis=0)                                                                   # (2H, 8H)

    return {
        "wx0": wx0.astype(compute_dtype),
        "b0": b0,                                        # biases stay f32 (added post-accumulate)
        "w_wave": w_wave.astype(compute_dtype),
        "b1": b1,
        "fc_w_t": jnp.asarray(params["fc_w"].T),         # (H, C), classifier kept f32
        "fc_b": jnp.asarray(params["fc_b"][None, :]),    # (1, C)
    }


# ------------------------------- pure-JAX reference ---------------------------------
def reference_forward(x, params):
    seq = jnp.transpose(x, (1, 0, 2)).astype(jnp.float32)
    for layer in params["lstm"]:
        T, B, _ = seq.shape
        H = layer["w_hh"].shape[1]
        w_ih_t, w_hh_t = layer["w_ih"].T, layer["w_hh"].T
        b = layer["b_ih"] + layer["b_hh"]

        def step(carry, x_t):
            h, c = carry
            gates = x_t @ w_ih_t + h @ w_hh_t + b
            i = jax.nn.sigmoid(gates[:, 0 * H:1 * H])
            f = jax.nn.sigmoid(gates[:, 1 * H:2 * H])
            g = jnp.tanh(gates[:, 2 * H:3 * H])
            o = jax.nn.sigmoid(gates[:, 3 * H:4 * H])
            c = f * c + i * g
            h = o * jnp.tanh(c)
            return (h, c), h

        init = (jnp.zeros((B, H), jnp.float32), jnp.zeros((B, H), jnp.float32))
        _, seq = jax.lax.scan(step, init, seq)
    return seq[-1] @ params["fc_w"].T + params["fc_b"]


# --------------------------------------- main ---------------------------------------
if __name__ == "__main__":
    # Small shapes consistent with the module: batch=2, seq=8, input_size=8,
    # hidden_size=32, num_layers=2, num_classes=4.
    B, T, INPUT_SIZE, HIDDEN, NUM_LAYERS, NUM_CLASSES = 2, 8, 8, 32, 2, 4

    key = jax.random.PRNGKey(0)
    key, xkey = jax.random.split(key)
    x = jax.random.normal(xkey, (B, T, INPUT_SIZE), jnp.float32)
    params = init_params(key, INPUT_SIZE, HIDDEN, NUM_LAYERS, NUM_CLASSES)
    ref = reference_forward(x, params)

    # f32 matmul operands: tight check against the pure-JAX reference.
    prep_f32 = prepare_params(params, compute_dtype=jnp.float32)
    out_f32 = jax.block_until_ready(model_forward(x, prep_f32))
    assert out_f32.shape == (B, NUM_CLASSES), out_f32.shape
    np.testing.assert_allclose(np.asarray(out_f32), np.asarray(ref), rtol=1e-4, atol=1e-4)

    # bf16 matmul operands (single-pass MXU; main per-step latency win on v5e, helps v6e/v7x).
    # Looser tolerance per the review's correctness note on the bf16 path.
    prep_bf16 = prepare_params(params, compute_dtype=jnp.bfloat16)
    out_bf16 = jax.block_until_ready(model_forward(x, prep_bf16))
    np.testing.assert_allclose(np.asarray(out_bf16), np.asarray(ref), rtol=5e-2, atol=5e-2)

    print("KERNEL_OK")
</pallas_src>

<mosaic_0001>
module attributes {stable_mosaic.version = 11 : i64} {
  func.func @kernel(%arg0: memref<16x8xf32, #tpu.memory_space<vmem>>, %arg1: memref<8x128xf32, #tpu.memory_space<vmem>>, %arg2: memref<1x128xf32, #tpu.memory_space<vmem>>, %arg3: memref<64x256xf32, #tpu.memory_space<vmem>>, %arg4: memref<1x128xf32, #tpu.memory_space<vmem>>, %arg5: memref<32x4xf32, #tpu.memory_space<vmem>>, %arg6: memref<1x4xf32, #tpu.memory_space<vmem>>, %arg7: memref<2x4xf32, #tpu.memory_space<vmem>>) attributes {dimension_semantics = [], scalar_prefetch = 0 : i64, scratch_operands = 0 : i64, tpu.core_type = #tpu.core_type<tc>} {
    %c0 = arith.constant 0 : index
    %c0_0 = arith.constant 0 : index
    %0 = vector.load %arg0[%c0, %c0_0] : memref<16x8xf32, #tpu.memory_space<vmem>>, vector<16x8xf32>
    %c0_1 = arith.constant 0 : index
    %c0_2 = arith.constant 0 : index
    %1 = vector.load %arg1[%c0_1, %c0_2] : memref<8x128xf32, #tpu.memory_space<vmem>>, vector<8x128xf32>
    %cst = arith.constant dense<0.000000e+00> : vector<16x128xf32>
    %2 = tpu.matmul %0, %1, %cst {dimension_numbers = #tpu.dot_dimension_numbers<[1], [0], [0], [1], [0, 0, 1, 1], [], []>} : vector<16x8xf32>, vector<8x128xf32>, vector<16x128xf32> -> vector<16x128xf32>
    %c0_3 = arith.constant 0 : index
    %c0_4 = arith.constant 0 : index
    %3 = vector.load %arg2[%c0_3, %c0_4] : memref<1x128xf32, #tpu.memory_space<vmem>>, vector<1x128xf32>
    %4 = vector.broadcast %3 : vector<1x128xf32> to vector<16x128xf32>
    %5 = arith.addf %2, %4 : vector<16x128xf32>
    %c0_5 = arith.constant 0 : index
    %c0_6 = arith.constant 0 : index
    %6 = vector.load %arg3[%c0_5, %c0_6] : memref<64x256xf32, #tpu.memory_space<vmem>>, vector<64x256xf32>
    %c0_7 = arith.constant 0 : index
    %c0_8 = arith.constant 0 : index
    %7 = vector.load %arg4[%c0_7, %c0_8] : memref<1x128xf32, #tpu.memory_space<vmem>>, vector<1x128xf32>
    %8 = vector.shape_cast %7 : vector<1x128xf32> to vector<1x128xf32>
    %9 = vector.broadcast %8 : vector<1x128xf32> to vector<2x128xf32>
    %cst_9 = arith.constant 0.000000e+00 : f32
    %10 = vector.broadcast %cst_9 : f32 to vector<2x32xf32>
    %11 = vector.extract_strided_slice %5 {offsets = [0, 0], sizes = [2, 128], strides = [1, 1]} : vector<16x128xf32> to vector<2x128xf32>
    %12 = arith.negf %11 : vector<2x128xf32>
    %13 = math.exp %12 : vector<2x128xf32>
    %cst_10 = arith.constant 1.000000e+00 : f32
    %14 = vector.broadcast %cst_10 : f32 to vector<2x128xf32>
    %15 = arith.addf %14, %13 : vector<2x128xf32>
    %16 = arith.divf %14, %15 : vector<2x128xf32>
    %17 = vector.extract_strided_slice %16 {offsets = [0, 0], sizes = [2, 32], strides = [1, 1]} : vector<2x128xf32> to vector<2x32xf32>
    %18 = vector.extract_strided_slice %16 {offsets = [0, 32], sizes = [2, 32], strides = [1, 1]} : vector<2x128xf32> to vector<2x32xf32>
    %19 = vector.extract_strided_slice %16 {offsets = [0, 64], sizes = [2, 32], strides = [1, 1]} : vector<2x128xf32> to vector<2x32xf32>
    %20 = vector.extract_strided_slice %16 {offsets = [0, 96], sizes = [2, 32], strides = [1, 1]} : vector<2x128xf32> to vector<2x32xf32>
    %cst_11 = arith.constant 2.000000e+00 : f32
    %21 = vector.broadcast %cst_11 : f32 to vector<2x32xf32>
    %22 = arith.mulf %21, %20 : vector<2x32xf32>
    %cst_12 = arith.constant 1.000000e+00 : f32
    %23 = vector.broadcast %cst_12 : f32 to vector<2x32xf32>
    %24 = arith.subf %22, %23 : vector<2x32xf32>
    %25 = arith.mulf %18, %10 : vector<2x32xf32>
    %26 = arith.mulf %17, %24 : vector<2x32xf32>
    %27 = arith.addf %25, %26 : vector<2x32xf32>
    %28 = math.tanh %27 : vector<2x32xf32>
    %29 = arith.mulf %19, %28 : vector<2x32xf32>
    %30 = tpu.concatenate %29, %10 in 1 : vector<2x32xf32>, vector<2x32xf32> -> vector<2x64xf32>
    %cst_13 = arith.constant dense<0.000000e+00> : vector<2x256xf32>
    %31 = tpu.matmul %30, %6, %cst_13 {dimension_numbers = #tpu.dot_dimension_numbers<[1], [0], [0], [1], [0, 0, 1, 1], [], []>} : vector<2x64xf32>, vector<64x256xf32>, vector<2x256xf32> -> vector<2x256xf32>
    %32 = vector.extract_strided_slice %5 {offsets = [2, 0], sizes = [2, 128], strides = [1, 1]} : vector<16x128xf32> to vector<2x128xf32>
    %33 = vector.extract_strided_slice %31 {offsets = [0, 0], sizes = [2, 128], strides = [1, 1]} : vector<2x256xf32> to vector<2x128xf32>
    %34 = arith.addf %32, %33 : vector<2x128xf32>
    %35 = vector.extract_strided_slice %31 {offsets = [0, 128], sizes = [2, 128], strides = [1, 1]} : vector<2x256xf32> to vector<2x128xf32>
    %36 = arith.addf %9, %35 : vector<2x128xf32>
    %37 = arith.negf %34 : vector<2x128xf32>
    %38 = math.exp %37 : vector<2x128xf32>
    %cst_14 = arith.constant 1.000000e+00 : f32
    %39 = vector.broadcast %cst_14 : f32 to vector<2x128xf32>
    %40 = arith.addf %39, %38 : vector<2x128xf32>
    %41 = arith.divf %39, %40 : vector<2x128xf32>
    %42 = vector.extract_strided_slice %41 {offsets = [0, 0], sizes = [2, 32], strides = [1, 1]} : vector<2x128xf32> to vector<2x32xf32>
    %43 = vector.extract_strided_slice %41 {offsets = [0, 32], sizes = [2, 32], strides = [1, 1]} : vector<2x128xf32> to vector<2x32xf32>
    %44 = vector.extract_strided_slice %41 {offsets = [0, 64], sizes = [2, 32], strides = [1, 1]} : vector<2x128xf32> to vector<2x32xf32>
    %45 = vector.extract_strided_slice %41 {offsets = [0, 96], sizes = [2, 32], strides = [1, 1]} : vector<2x128xf32> to vector<2x32xf32>
    %cst_15 = arith.constant 2.000000e+00 : f32
    %46 = vector.broadcast %cst_15 : f32 to vector<2x32xf32>
    %47 = arith.mulf %46, %45 : vector<2x32xf32>
    %cst_16 = arith.constant 1.000000e+00 : f32
    %48 = vector.broadcast %cst_16 : f32 to vector<2x32xf32>
    %49 = arith.subf %47, %48 : vector<2x32xf32>
    %50 = arith.mulf %43, %27 : vector<2x32xf32>
    %51 = arith.mulf %42, %49 : vector<2x32xf32>
    %52 = arith.addf %50, %51 : vector<2x32xf32>
    %53 = math.tanh %52 : vector<2x32xf32>
    %54 = arith.mulf %44, %53 : vector<2x32xf32>
    %55 = arith.negf %36 : vector<2x128xf32>
    %56 = math.exp %55 : vector<2x128xf32>
    %cst_17 = arith.constant 1.000000e+00 : f32
    %57 = vector.broadcast %cst_17 : f32 to vector<2x128xf32>
    %58 = arith.addf %57, %56 : vector<2x128xf32>
    %59 = arith.divf %57, %58 : vector<2x128xf32>
    %60 = vector.extract_strided_slice %59 {offsets = [0, 0], sizes = [2, 32], strides = [1, 1]} : vector<2x128xf32> to vector<2x32xf32>
    %61 = vector.extract_strided_slice %59 {offsets = [0, 32], sizes = [2, 32], strides = [1, 1]} : vector<2x128xf32> to vector<2x32xf32>
    %62 = vector.extract_strided_slice %59 {offsets = [0, 64], sizes = [2, 32], strides = [1, 1]} : vector<2x128xf32> to vector<2x32xf32>
    %63 = vector.extract_strided_slice %59 {offsets = [0, 96], sizes = [2, 32], strides = [1, 1]} : vector<2x128xf32> to vector<2x32xf32>
    %cst_18 = arith.constant 2.000000e+00 : f32
    %64 = vector.broadcast %cst_18 : f32 to vector<2x32xf32>
    %65 = arith.mulf %64, %63 : vector<2x32xf32>
    %cst_19 = arith.constant 1.000000e+00 : f32
    %66 = vector.broadcast %cst_19 : f32 to vector<2x32xf32>
    %67 = arith.subf %65, %66 : vector<2x32xf32>
    %68 = arith.mulf %61, %10 : vector<2x32xf32>
    %69 = arith.mulf %60, %67 : vector<2x32xf32>
    %70 = arith.addf %68, %69 : vector<2x32xf32>
    %71 = math.tanh %70 : vector<2x32xf32>
    %72 = arith.mulf %62, %71 : vector<2x32xf32>
    %73 = tpu.concatenate %54, %72 in 1 : vector<2x32xf32>, vector<2x32xf32> -> vector<2x64xf32>
    %cst_20 = arith.constant dense<0.000000e+00> : vector<2x256xf32>
    %74 = tpu.matmul %73, %6, %cst_20 {dimension_numbers = #tpu.dot_dimension_numbers<[1], [0], [0], [1], [0, 0, 1, 1], [], []>} : vector<2x64xf32>, vector<64x256xf32>, vector<2x256xf32> -> vector<2x256xf32>
    %75 = vector.extract_strided_slice %5 {offsets = [4, 0], sizes = [2, 128], strides = [1, 1]} : vector<16x128xf32> to vector<2x128xf32>
    %76 = vector.extract_strided_slice %74 {offsets = [0, 0], sizes = [2, 128], strides = [1, 1]} : vector<2x256xf32> to vector<2x128xf32>
    %77 = arith.addf %75, %76 : vector<2x128xf32>
    %78 = vector.extract_strided_slice %74 {offsets = [0, 128], sizes = [2, 128], strides = [1, 1]} : vector<2x256xf32> to vector<2x128xf32>
    %79 = arith.addf %9, %78 : vector<2x128xf32>
    %80 = arith.negf %77 : vector<2x128xf32>
    %81 = math.exp %80 : vector<2x128xf32>
    %cst_21 = arith.constant 1.000000e+00 : f32
    %82 = vector.broadcast %cst_21 : f32 to vector<2x128xf32>
    %83 = arith.addf %82, %81 : vector<2x128xf32>
    %84 = arith.divf %82, %83 : vector<2x128xf32>
    %85 = vector.extract_strided_slice %84 {offsets = [0, 0], sizes = [2, 32], strides = [1, 1]} : vector<2x128xf32> to vector<2x32xf32>
    %86 = vector.extract_strided_slice %84 {offsets = [0, 32], sizes = [2, 32], strides = [1, 1]} : vector<2x128xf32> to vector<2x32xf32>
    %87 = vector.extract_strided_slice %84 {offsets = [0, 64], sizes = [2, 32], strides = [1, 1]} : vector<2x128xf32> to vector<2x32xf32>
    %88 = vector.extract_strided_slice %84 {offsets = [0, 96], sizes = [2, 32], strides = [1, 1]} : vector<2x128xf32> to vector<2x32xf32>
    %cst_22 = arith.constant 2.000000e+00 : f32
    %89 = vector.broadcast %cst_22 : f32 to vector<2x32xf32>
    %90 = arith.mulf %89, %88 : vector<2x32xf32>
    %cst_23 = arith.constant 1.000000e+00 : f32
    %91 = vector.broadcast %cst_23 : f32 to vector<2x32xf32>
    %92 = arith.subf %90, %91 : vector<2x32xf32>
    %93 = arith.mulf %86, %52 : vector<2x32xf32>
    %94 = arith.mulf %85, %92 : vector<2x32xf32>
    %95 = arith.addf %93, %94 : vector<2x32xf32>
    %96 = math.tanh %95 : vector<2x32xf32>
    %97 = arith.mulf %87, %96 : vector<2x32xf32>
    %98 = arith.negf %79 : vector<2x128xf32>
    %99 = math.exp %98 : vector<2x128xf32>
    %cst_24 = arith.constant 1.000000e+00 : f32
    %100 = vector.broadcast %cst_24 : f32 to vector<2x128xf32>
    %101 = arith.addf %100, %99 : vector<2x128xf32>
    %102 = arith.divf %100, %101 : vector<2x128xf32>
    %103 = vector.extract_strided_slice %102 {offsets = [0, 0], sizes = [2, 32], strides = [1, 1]} : vector<2x128xf32> to vector<2x32xf32>
    %104 = vector.extract_strided_slice %102 {offsets = [0, 32], sizes = [2, 32], strides = [1, 1]} : vector<2x128xf32> to vector<2x32xf32>
    %105 = vector.extract_strided_slice %102 {offsets = [0, 64], sizes = [2, 32], strides = [1, 1]} : vector<2x128xf32> to vector<2x32xf32>
    %106 = vector.extract_strided_slice %102 {offsets = [0, 96], sizes = [2, 32], strides = [1, 1]} : vector<2x128xf32> to vector<2x32xf32>
    %cst_25 = arith.constant 2.000000e+00 : f32
    %107 = vector.broadcast %cst_25 : f32 to vector<2x32xf32>
    %108 = arith.mulf %107, %106 : vector<2x32xf32>
    %cst_26 = arith.constant 1.000000e+00 : f32
    %109 = vector.broadcast %cst_26 : f32 to vector<2x32xf32>
    %110 = arith.subf %108, %109 : vector<2x32xf32>
    %111 = arith.mulf %104, %70 : vector<2x32xf32>
    %112 = arith.mulf %103, %110 : vector<2x32xf32>
    %113 = arith.addf %111, %112 : vector<2x32xf32>
    %114 = math.tanh %113 : vector<2x32xf32>
    %115 = arith.mulf %105, %114 : vector<2x32xf32>
    %116 = tpu.concatenate %97, %115 in 1 : vector<2x32xf32>, vector<2x32xf32> -> vector<2x64xf32>
    %cst_27 = arith.constant dense<0.000000e+00> : vector<2x256xf32>
    %117 = tpu.matmul %116, %6, %cst_27 {dimension_numbers = #tpu.dot_dimension_numbers<[1], [0], [0], [1], [0, 0, 1, 1], [], []>} : vector<2x64xf32>, vector<64x256xf32>, vector<2x256xf32> -> vector<2x256xf32>
    %118 = vector.extract_strided_slice %5 {offsets = [6, 0], sizes = [2, 128], strides = [1, 1]} : vector<16x128xf32> to vector<2x128xf32>
    %119 = vector.extract_strided_slice %117 {offsets = [0, 0], sizes = [2, 128], strides = [1, 1]} : vector<2x256xf32> to vector<2x128xf32>
    %120 = arith.addf %118, %119 : vector<2x128xf32>
    %121 = vector.extract_strided_slice %117 {offsets = [0, 128], sizes = [2, 128], strides = [1, 1]} : vector<2x256xf32> to vector<2x128xf32>
    %122 = arith.addf %9, %121 : vector<2x128xf32>
    %123 = arith.negf %120 : vector<2x128xf32>
    %124 = math.exp %123 : vector<2x128xf32>
    %cst_28 = arith.constant 1.000000e+00 : f32
    %125 = vector.broadcast %cst_28 : f32 to vector<2x128xf32>
    %126 = arith.addf %125, %124 : vector<2x128xf32>
    %127 = arith.divf %125, %126 : vector<2x128xf32>
    %128 = vector.extract_strided_slice %127 {offsets = [0, 0], sizes = [2, 32], strides = [1, 1]} : vector<2x128xf32> to vector<2x32xf32>
    %129 = vector.extract_strided_slice %127 {offsets = [0, 32], sizes = [2, 32], strides = [1, 1]} : vector<2x128xf32> to vector<2x32xf32>
    %130 = vector.extract_strided_slice %127 {offsets = [0, 64], sizes = [2, 32], strides = [1, 1]} : vector<2x128xf32> to vector<2x32xf32>
    %131 = vector.extract_strided_slice %127 {offsets = [0, 96], sizes = [2, 32], strides = [1, 1]} : vector<2x128xf32> to vector<2x32xf32>
    %cst_29 = arith.constant 2.000000e+00 : f32
    %132 = vector.broadcast %cst_29 : f32 to vector<2x32xf32>
    %133 = arith.mulf %132, %131 : vector<2x32xf32>
    %cst_30 = arith.constant 1.000000e+00 : f32
    %134 = vector.broadcast %cst_30 : f32 to vector<2x32xf32>
    %135 = arith.subf %133, %134 : vector<2x32xf32>
    %136 = arith.mulf %129, %95 : vector<2x32xf32>
    %137 = arith.mulf %128, %135 : vector<2x32xf32>
    %138 = arith.addf %136, %137 : vector<2x32xf32>
    %139 = math.tanh %138 : vector<2x32xf32>
    %140 = arith.mulf %130, %139 : vector<2x32xf32>
    %141 = arith.negf %122 : vector<2x128xf32>
    %142 = math.exp %141 : vector<2x128xf32>
    %cst_31 = arith.constant 1.000000e+00 : f32
    %143 = vector.broadcast %cst_31 : f32 to vector<2x128xf32>
    %144 = arith.addf %143, %142 : vector<2x128xf32>
    %145 = arith.divf %143, %144 : vector<2x128xf32>
    %146 = vector.extract_strided_slice %145 {offsets = [0, 0], sizes = [2, 32], strides = [1, 1]} : vector<2x128xf32> to vector<2x32xf32>
    %147 = vector.extract_strided_slice %145 {offsets = [0, 32], sizes = [2, 32], strides = [1, 1]} : vector<2x128xf32> to vector<2x32xf32>
    %148 = vector.extract_strided_slice %145 {offsets = [0, 64], sizes = [2, 32], strides = [1, 1]} : vector<2x128xf32> to vector<2x32xf32>
    %149 = vector.extract_strided_slice %145 {offsets = [0, 96], sizes = [2, 32], strides = [1, 1]} : vector<2x128xf32> to vector<2x32xf32>
    %cst_32 = arith.constant 2.000000e+00 : f32
    %150 = vector.broadcast %cst_32 : f32 to vector<2x32xf32>
    %151 = arith.mulf %150, %149 : vector<2x32xf32>
    %cst_33 = arith.constant 1.000000e+00 : f32
    %152 = vector.broadcast %cst_33 : f32 to vector<2x32xf32>
    %153 = arith.subf %151, %152 : vector<2x32xf32>
    %154 = arith.mulf %147, %113 : vector<2x32xf32>
    %155 = arith.mulf %146, %153 : vector<2x32xf32>
    %156 = arith.addf %154, %155 : vector<2x32xf32>
    %157 = math.tanh %156 : vector<2x32xf32>
    %158 = arith.mulf %148, %157 : vector<2x32xf32>
    %159 = tpu.concatenate %140, %158 in 1 : vector<2x32xf32>, vector<2x32xf32> -> vector<2x64xf32>
    %cst_34 = arith.constant dense<0.000000e+00> : vector<2x256xf32>
    %160 = tpu.matmul %159, %6, %cst_34 {dimension_numbers = #tpu.dot_dimension_numbers<[1], [0], [0], [1], [0, 0, 1, 1], [], []>} : vector<2x64xf32>, vector<64x256xf32>, vector<2x256xf32> -> vector<2x256xf32>
    %161 = vector.extract_strided_slice %5 {offsets = [8, 0], sizes = [2, 128], strides = [1, 1]} : vector<16x128xf32> to vector<2x128xf32>
    %162 = vector.extract_strided_slice %160 {offsets = [0, 0], sizes = [2, 128], strides = [1, 1]} : vector<2x256xf32> to vector<2x128xf32>
    %163 = arith.addf %161, %162 : vector<2x128xf32>
    %164 = vector.extract_strided_slice %160 {offsets = [0, 128], sizes = [2, 128], strides = [1, 1]} : vector<2x256xf32> to vector<2x128xf32>
    %165 = arith.addf %9, %164 : vector<2x128xf32>
    %166 = arith.negf %163 : vector<2x128xf32>
    %167 = math.exp %166 : vector<2x128xf32>
    %cst_35 = arith.constant 1.000000e+00 : f32
    %168 = vector.broadcast %cst_35 : f32 to vector<2x128xf32>
    %169 = arith.addf %168, %167 : vector<2x128xf32>
    %170 = arith.divf %168, %169 : vector<2x128xf32>
    %171 = vector.extract_strided_slice %170 {offsets = [0, 0], sizes = [2, 32], strides = [1, 1]} : vector<2x128xf32> to vector<2x32xf32>
    %172 = vector.extract_strided_slice %170 {offsets = [0, 32], sizes = [2, 32], strides = [1, 1]} : vector<2x128xf32> to vector<2x32xf32>
    %173 = vector.extract_strided_slice %170 {offsets = [0, 64], sizes = [2, 32], strides = [1, 1]} : vector<2x128xf32> to vector<2x32xf32>
    %174 = vector.extract_strided_slice %170 {offsets = [0, 96], sizes = [2, 32], strides = [1, 1]} : vector<2x128xf32> to vector<2x32xf32>
    %cst_36 = arith.constant 2.000000e+00 : f32
    %175 = vector.broadcast %cst_36 : f32 to vector<2x32xf32>
    %176 = arith.mulf %175, %174 : vector<2x32xf32>
    %cst_37 = arith.constant 1.000000e+00 : f32
    %177 = vector.broadcast %cst_37 : f32 to vector<2x32xf32>
    %178 = arith.subf %176, %177 : vector<2x32xf32>
    %179 = arith.mulf %172, %138 : vector<2x32xf32>
    %180 = arith.mulf %171, %178 : vector<2x32xf32>
    %181 = arith.addf %179, %180 : vector<2x32xf32>
    %182 = math.tanh %181 : vector<2x32xf32>
    %183 = arith.mulf %173, %182 : vector<2x32xf32>
    %184 = arith.negf %165 : vector<2x128xf32>
    %185 = math.exp %184 : vector<2x128xf32>
    %cst_38 = arith.constant 1.000000e+00 : f32
    %186 = vector.broadcast %cst_38 : f32 to vector<2x128xf32>
    %187 = arith.addf %186, %185 : vector<2x128xf32>
    %188 = arith.divf %186, %187 : vector<2x128xf32>
    %189 = vector.extract_strided_slice %188 {offsets = [0, 0], sizes = [2, 32], strides = [1, 1]} : vector<2x128xf32> to vector<2x32xf32>
    %190 = vector.extract_strided_slice %188 {offsets = [0, 32], sizes = [2, 32], strides = [1, 1]} : vector<2x128xf32> to vector<2x32xf32>
    %191 = vector.extract_strided_slice %188 {offsets = [0, 64], sizes = [2, 32], strides = [1, 1]} : vector<2x128xf32> to vector<2x32xf32>
    %192 = vector.extract_strided_slice %188 {offsets = [0, 96], sizes = [2, 32], strides = [1, 1]} : vector<2x128xf32> to vector<2x32xf32>
    %cst_39 = arith.constant 2.000000e+00 : f32
    %193 = vector.broadcast %cst_39 : f32 to vector<2x32xf32>
    %194 = arith.mulf %193, %192 : vector<2x32xf32>
    %cst_40 = arith.constant 1.000000e+00 : f32
    %195 = vector.broadcast %cst_40 : f32 to vector<2x32xf32>
    %196 = arith.subf %194, %195 : vector<2x32xf32>
    %197 = arith.mulf %190, %156 : vector<2x32xf32>
    %198 = arith.mulf %189, %196 : vector<2x32xf32>
    %199 = arith.addf %197, %198 : vector<2x32xf32>
    %200 = math.tanh %199 : vector<2x32xf32>
    %201 = arith.mulf %191, %200 : vector<2x32xf32>
    %202 = tpu.concatenate %183, %201 in 1 : vector<2x32xf32>, vector<2x32xf32> -> vector<2x64xf32>
    %cst_41 = arith.constant dense<0.000000e+00> : vector<2x256xf32>
    %203 = tpu.matmul %202, %6, %cst_41 {dimension_numbers = #tpu.dot_dimension_numbers<[1], [0], [0], [1], [0, 0, 1, 1], [], []>} : vector<2x64xf32>, vector<64x256xf32>, vector<2x256xf32> -> vector<2x256xf32>
    %204 = vector.extract_strided_slice %5 {offsets = [10, 0], sizes = [2, 128], strides = [1, 1]} : vector<16x128xf32> to vector<2x128xf32>
    %205 = vector.extract_strided_slice %203 {offsets = [0, 0], sizes = [2, 128], strides = [1, 1]} : vector<2x256xf32> to vector<2x128xf32>
    %206 = arith.addf %204, %205 : vector<2x128xf32>
    %207 = vector.extract_strided_slice %203 {offsets = [0, 128], sizes = [2, 128], strides = [1, 1]} : vector<2x256xf32> to vector<2x128xf32>
    %208 = arith.addf %9, %207 : vector<2x128xf32>
    %209 = arith.negf %206 : vector<2x128xf32>
    %210 = math.exp %209 : vector<2x128xf32>
    %cst_42 = arith.constant 1.000000e+00 : f32
    %211 = vector.broadcast %cst_42 : f32 to vector<2x128xf32>
    %212 = arith.addf %211, %210 : vector<2x128xf32>
    %213 = arith.divf %211, %212 : vector<2x128xf32>
    %214 = vector.extract_strided_slice %213 {offsets = [0, 0], sizes = [2, 32], strides = [1, 1]} : vector<2x128xf32> to vector<2x32xf32>
    %215 = vector.extract_strided_slice %213 {offsets = [0, 32], sizes = [2, 32], strides = [1, 1]} : vector<2x128xf32> to vector<2x32xf32>
    %216 = vector.extract_strided_slice %213 {offsets = [0, 64], sizes = [2, 32], strides = [1, 1]} : vector<2x128xf32> to vector<2x32xf32>
    %217 = vector.extract_strided_slice %213 {offsets = [0, 96], sizes = [2, 32], strides = [1, 1]} : vector<2x128xf32> to vector<2x32xf32>
    %cst_43 = arith.constant 2.000000e+00 : f32
    %218 = vector.broadcast %cst_43 : f32 to vector<2x32xf32>
    %219 = arith.mulf %218, %217 : vector<2x32xf32>
    %cst_44 = arith.constant 1.000000e+00 : f32
    %220 = vector.broadcast %cst_44 : f32 to vector<2x32xf32>
    %221 = arith.subf %219, %220 : vector<2x32xf32>
    %222 = arith.mulf %215, %181 : vector<2x32xf32>
    %223 = arith.mulf %214, %221 : vector<2x32xf32>
    %224 = arith.addf %222, %223 : vector<2x32xf32>
    %225 = math.tanh %224 : vector<2x32xf32>
    %226 = arith.mulf %216, %225 : vector<2x32xf32>
    %227 = arith.negf %208 : vector<2x128xf32>
    %228 = math.exp %227 : vector<2x128xf32>
    %cst_45 = arith.constant 1.000000e+00 : f32
    %229 = vector.broadcast %cst_45 : f32 to vector<2x128xf32>
    %230 = arith.addf %229, %228 : vector<2x128xf32>
    %231 = arith.divf %229, %230 : vector<2x128xf32>
    %232 = vector.extract_strided_slice %231 {offsets = [0, 0], sizes = [2, 32], strides = [1, 1]} : vector<2x128xf32> to vector<2x32xf32>
    %233 = vector.extract_strided_slice %231 {offsets = [0, 32], sizes = [2, 32], strides = [1, 1]} : vector<2x128xf32> to vector<2x32xf32>
    %234 = vector.extract_strided_slice %231 {offsets = [0, 64], sizes = [2, 32], strides = [1, 1]} : vector<2x128xf32> to vector<2x32xf32>
    %235 = vector.extract_strided_slice %231 {offsets = [0, 96], sizes = [2, 32], strides = [1, 1]} : vector<2x128xf32> to vector<2x32xf32>
    %cst_46 = arith.constant 2.000000e+00 : f32
    %236 = vector.broadcast %cst_46 : f32 to vector<2x32xf32>
    %237 = arith.mulf %236, %235 : vector<2x32xf32>
    %cst_47 = arith.constant 1.000000e+00 : f32
    %238 = vector.broadcast %cst_47 : f32 to vector<2x32xf32>
    %239 = arith.subf %237, %238 : vector<2x32xf32>
    %240 = arith.mulf %233, %199 : vector<2x32xf32>
    %241 = arith.mulf %232, %239 : vector<2x32xf32>
    %242 = arith.addf %240, %241 : vector<2x32xf32>
    %243 = math.tanh %242 : vector<2x32xf32>
    %244 = arith.mulf %234, %243 : vector<2x32xf32>
    %245 = tpu.concatenate %226, %244 in 1 : vector<2x32xf32>, vector<2x32xf32> -> vector<2x64xf32>
    %cst_48 = arith.constant dense<0.000000e+00> : vector<2x256xf32>
    %246 = tpu.matmul %245, %6, %cst_48 {dimension_numbers = #tpu.dot_dimension_numbers<[1], [0], [0], [1], [0, 0, 1, 1], [], []>} : vector<2x64xf32>, vector<64x256xf32>, vector<2x256xf32> -> vector<2x256xf32>
    %247 = vector.extract_strided_slice %5 {offsets = [12, 0], sizes = [2, 128], strides = [1, 1]} : vector<16x128xf32> to vector<2x128xf32>
    %248 = vector.extract_strided_slice %246 {offsets = [0, 0], sizes = [2, 128], strides = [1, 1]} : vector<2x256xf32> to vector<2x128xf32>
    %249 = arith.addf %247, %248 : vector<2x128xf32>
    %250 = vector.extract_strided_slice %246 {offsets = [0, 128], sizes = [2, 128], strides = [1, 1]} : vector<2x256xf32> to vector<2x128xf32>
    %251 = arith.addf %9, %250 : vector<2x128xf32>
    %252 = arith.negf %249 : vector<2x128xf32>
    %253 = math.exp %252 : vector<2x128xf32>
    %cst_49 = arith.constant 1.000000e+00 : f32
    %254 = vector.broadcast %cst_49 : f32 to vector<2x128xf32>
    %255 = arith.addf %254, %253 : vector<2x128xf32>
    %256 = arith.divf %254, %255 : vector<2x128xf32>
    %257 = vector.extract_strided_slice %256 {offsets = [0, 0], sizes = [2, 32], strides = [1, 1]} : vector<2x128xf32> to vector<2x32xf32>
    %258 = vector.extract_strided_slice %256 {offsets = [0, 32], sizes = [2, 32], strides = [1, 1]} : vector<2x128xf32> to vector<2x32xf32>
    %259 = vector.extract_strided_slice %256 {offsets = [0, 64], sizes = [2, 32], strides = [1, 1]} : vector<2x128xf32> to vector<2x32xf32>
    %260 = vector.extract_strided_slice %256 {offsets = [0, 96], sizes = [2, 32], strides = [1, 1]} : vector<2x128xf32> to vector<2x32xf32>
    %cst_50 = arith.constant 2.000000e+00 : f32
    %261 = vector.broadcast %cst_50 : f32 to vector<2x32xf32>
    %262 = arith.mulf %261, %260 : vector<2x32xf32>
    %cst_51 = arith.constant 1.000000e+00 : f32
    %263 = vector.broadcast %cst_51 : f32 to vector<2x32xf32>
    %264 = arith.subf %262, %263 : vector<2x32xf32>
    %265 = arith.mulf %258, %224 : vector<2x32xf32>
    %266 = arith.mulf %257, %264 : vector<2x32xf32>
    %267 = arith.addf %265, %266 : vector<2x32xf32>
    %268 = math.tanh %267 : vector<2x32xf32>
    %269 = arith.mulf %259, %268 : vector<2x32xf32>
    %270 = arith.negf %251 : vector<2x128xf32>
    %271 = math.exp %270 : vector<2x128xf32>
    %cst_52 = arith.constant 1.000000e+00 : f32
    %272 = vector.broadcast %cst_52 : f32 to vector<2x128xf32>
    %273 = arith.addf %272, %271 : vector<2x128xf32>
    %274 = arith.divf %272, %273 : vector<2x128xf32>
    %275 = vector.extract_strided_slice %274 {offsets = [0, 0], sizes = [2, 32], strides = [1, 1]} : vector<2x128xf32> to vector<2x32xf32>
    %276 = vector.extract_strided_slice %274 {offsets = [0, 32], sizes = [2, 32], strides = [1, 1]} : vector<2x128xf32> to vector<2x32xf32>
    %277 = vector.extract_strided_slice %274 {offsets = [0, 64], sizes = [2, 32], strides = [1, 1]} : vector<2x128xf32> to vector<2x32xf32>
    %278 = vector.extract_strided_slice %274 {offsets = [0, 96], sizes = [2, 32], strides = [1, 1]} : vector<2x128xf32> to vector<2x32xf32>
    %cst_53 = arith.constant 2.000000e+00 : f32
    %279 = vector.broadcast %cst_53 : f32 to vector<2x32xf32>
    %280 = arith.mulf %279, %278 : vector<2x32xf32>
    %cst_54 = arith.constant 1.000000e+00 : f32
    %281 = vector.broadcast %cst_54 : f32 to vector<2x32xf32>
    %282 = arith.subf %280, %281 : vector<2x32xf32>
    %283 = arith.mulf %276, %242 : vector<2x32xf32>
    %284 = arith.mulf %275, %282 : vector<2x32xf32>
    %285 = arith.addf %283, %284 : vector<2x32xf32>
    %286 = math.tanh %285 : vector<2x32xf32>
    %287 = arith.mulf %277, %286 : vector<2x32xf32>
    %288 = tpu.concatenate %269, %287 in 1 : vector<2x32xf32>, vector<2x32xf32> -> vector<2x64xf32>
    %cst_55 = arith.constant dense<0.000000e+00> : vector<2x256xf32>
    %289 = tpu.matmul %288, %6, %cst_55 {dimension_numbers = #tpu.dot_dimension_numbers<[1], [0], [0], [1], [0, 0, 1, 1], [], []>} : vector<2x64xf32>, vector<64x256xf32>, vector<2x256xf32> -> vector<2x256xf32>
    %290 = vector.extract_strided_slice %5 {offsets = [14, 0], sizes = [2, 128], strides = [1, 1]} : vector<16x128xf32> to vector<2x128xf32>
    %291 = vector.extract_strided_slice %289 {offsets = [0, 0], sizes = [2, 128], strides = [1, 1]} : vector<2x256xf32> to vector<2x128xf32>
    %292 = arith.addf %290, %291 : vector<2x128xf32>
    %293 = vector.extract_strided_slice %289 {offsets = [0, 128], sizes = [2, 128], strides = [1, 1]} : vector<2x256xf32> to vector<2x128xf32>
    %294 = arith.addf %9, %293 : vector<2x128xf32>
    %295 = arith.negf %292 : vector<2x128xf32>
    %296 = math.exp %295 : vector<2x128xf32>
    %cst_56 = arith.constant 1.000000e+00 : f32
    %297 = vector.broadcast %cst_56 : f32 to vector<2x128xf32>
    %298 = arith.addf %297, %296 : vector<2x128xf32>
    %299 = arith.divf %297, %298 : vector<2x128xf32>
    %300 = vector.extract_strided_slice %299 {offsets = [0, 0], sizes = [2, 32], strides = [1, 1]} : vector<2x128xf32> to vector<2x32xf32>
    %301 = vector.extract_strided_slice %299 {offsets = [0, 32], sizes = [2, 32], strides = [1, 1]} : vector<2x128xf32> to vector<2x32xf32>
    %302 = vector.extract_strided_slice %299 {offsets = [0, 64], sizes = [2, 32], strides = [1, 1]} : vector<2x128xf32> to vector<2x32xf32>
    %303 = vector.extract_strided_slice %299 {offsets = [0, 96], sizes = [2, 32], strides = [1, 1]} : vector<2x128xf32> to vector<2x32xf32>
    %cst_57 = arith.constant 2.000000e+00 : f32
    %304 = vector.broadcast %cst_57 : f32 to vector<2x32xf32>
    %305 = arith.mulf %304, %303 : vector<2x32xf32>
    %cst_58 = arith.constant 1.000000e+00 : f32
    %306 = vector.broadcast %cst_58 : f32 to vector<2x32xf32>
    %307 = arith.subf %305, %306 : vector<2x32xf32>
    %308 = arith.mulf %301, %267 : vector<2x32xf32>
    %309 = arith.mulf %300, %307 : vector<2x32xf32>
    %310 = arith.addf %308, %309 : vector<2x32xf32>
    %311 = math.tanh %310 : vector<2x32xf32>
    %312 = arith.mulf %302, %311 : vector<2x32xf32>
    %313 = arith.negf %294 : vector<2x128xf32>
    %314 = math.exp %313 : vector<2x128xf32>
    %cst_59 = arith.constant 1.000000e+00 : f32
    %315 = vector.broadcast %cst_59 : f32 to vector<2x128xf32>
    %316 = arith.addf %315, %314 : vector<2x128xf32>
    %317 = arith.divf %315, %316 : vector<2x128xf32>
    %318 = vector.extract_strided_slice %317 {offsets = [0, 0], sizes = [2, 32], strides = [1, 1]} : vector<2x128xf32> to vector<2x32xf32>
    %319 = vector.extract_strided_slice %317 {offsets = [0, 32], sizes = [2, 32], strides = [1, 1]} : vector<2x128xf32> to vector<2x32xf32>
    %320 = vector.extract_strided_slice %317 {offsets = [0, 64], sizes = [2, 32], strides = [1, 1]} : vector<2x128xf32> to vector<2x32xf32>
    %321 = vector.extract_strided_slice %317 {offsets = [0, 96], sizes = [2, 32], strides = [1, 1]} : vector<2x128xf32> to vector<2x32xf32>
    %cst_60 = arith.constant 2.000000e+00 : f32
    %322 = vector.broadcast %cst_60 : f32 to vector<2x32xf32>
    %323 = arith.mulf %322, %321 : vector<2x32xf32>
    %cst_61 = arith.constant 1.000000e+00 : f32
    %324 = vector.broadcast %cst_61 : f32 to vector<2x32xf32>
    %325 = arith.subf %323, %324 : vector<2x32xf32>
    %326 = arith.mulf %319, %285 : vector<2x32xf32>
    %327 = arith.mulf %318, %325 : vector<2x32xf32>
    %328 = arith.addf %326, %327 : vector<2x32xf32>
    %329 = math.tanh %328 : vector<2x32xf32>
    %330 = arith.mulf %320, %329 : vector<2x32xf32>
    %331 = tpu.concatenate %312, %330 in 1 : vector<2x32xf32>, vector<2x32xf32> -> vector<2x64xf32>
    %332 = vector.extract_strided_slice %6 {offsets = [0, 128], sizes = [64, 128], strides = [1, 1]} : vector<64x256xf32> to vector<64x128xf32>
    %cst_62 = arith.constant dense<0.000000e+00> : vector<2x128xf32>
    %333 = tpu.matmul %331, %332, %cst_62 {dimension_numbers = #tpu.dot_dimension_numbers<[1], [0], [0], [1], [0, 0, 1, 1], [], []>} : vector<2x64xf32>, vector<64x128xf32>, vector<2x128xf32> -> vector<2x128xf32>
    %334 = arith.addf %9, %333 : vector<2x128xf32>
    %335 = arith.negf %334 : vector<2x128xf32>
    %336 = math.exp %335 : vector<2x128xf32>
    %cst_63 = arith.constant 1.000000e+00 : f32
    %337 = vector.broadcast %cst_63 : f32 to vector<2x128xf32>
    %338 = arith.addf %337, %336 : vector<2x128xf32>
    %339 = arith.divf %337, %338 : vector<2x128xf32>
    %340 = vector.extract_strided_slice %339 {offsets = [0, 0], sizes = [2, 32], strides = [1, 1]} : vector<2x128xf32> to vector<2x32xf32>
    %341 = vector.extract_strided_slice %339 {offsets = [0, 32], sizes = [2, 32], strides = [1, 1]} : vector<2x128xf32> to vector<2x32xf32>
    %342 = vector.extract_strided_slice %339 {offsets = [0, 64], sizes = [2, 32], strides = [1, 1]} : vector<2x128xf32> to vector<2x32xf32>
    %343 = vector.extract_strided_slice %339 {offsets = [0, 96], sizes = [2, 32], strides = [1, 1]} : vector<2x128xf32> to vector<2x32xf32>
    %cst_64 = arith.constant 2.000000e+00 : f32
    %344 = vector.broadcast %cst_64 : f32 to vector<2x32xf32>
    %345 = arith.mulf %344, %343 : vector<2x32xf32>
    %cst_65 = arith.constant 1.000000e+00 : f32
    %346 = vector.broadcast %cst_65 : f32 to vector<2x32xf32>
    %347 = arith.subf %345, %346 : vector<2x32xf32>
    %348 = arith.mulf %341, %328 : vector<2x32xf32>
    %349 = arith.mulf %340, %347 : vector<2x32xf32>
    %350 = arith.addf %348, %349 : vector<2x32xf32>
    %351 = math.tanh %350 : vector<2x32xf32>
    %352 = arith.mulf %342, %351 : vector<2x32xf32>
    %c0_66 = arith.constant 0 : index
    %c0_67 = arith.constant 0 : index
    %353 = vector.load %arg5[%c0_66, %c0_67] : memref<32x4xf32, #tpu.memory_space<vmem>>, vector<32x4xf32>
    %cst_68 = arith.constant dense<0.000000e+00> : vector<2x4xf32>
    %354 = tpu.matmul %352, %353, %cst_68 {dimension_numbers = #tpu.dot_dimension_numbers<[1], [0], [0], [1], [0, 0, 1, 1], [], []>} : vector<2x32xf32>, vector<32x4xf32>, vector<2x4xf32> -> vector<2x4xf32>
    %c0_69 = arith.constant 0 : index
    %c0_70 = arith.constant 0 : index
    %355 = vector.load %arg6[%c0_69, %c0_70] : memref<1x4xf32, #tpu.memory_space<vmem>>, vector<1x4xf32>
    %356 = vector.broadcast %355 : vector<1x4xf32> to vector<2x4xf32>
    %357 = arith.addf %354, %356 : vector<2x4xf32>
    %c0_71 = arith.constant 0 : index
    %c0_72 = arith.constant 0 : index
    %358 = vector.load %arg7[%c0_71, %c0_72] : memref<2x4xf32, #tpu.memory_space<vmem>>, vector<2x4xf32>
    tpu.vector_store %arg7[%c0_71, %c0_72], %357 {strides = array<i32>} : memref<2x4xf32, #tpu.memory_space<vmem>>, vector<2x4xf32>,
    return
  }
}

</mosaic_0001>

<bundles_post_ra>
// kernel: model_forward.1
= control target key start
LH: loop header
LB: loop body
LE: loop exit
PB: predicated region body
PF: predicated region fallthrough
CT: control target
= control target key end

     0   :  { %12 = vsyncpa [#allocation3], 0  ;;  %s2064_s0 = inlined_call_operand.vmem [shape: f32[16,8], index: 0, kind: input, shape index: {}]   ;;  %s2065_s1 = inlined_call_operand.vmem [shape: f32[8,128], index: 1, kind: input, shape index: {}]   ;;  %s2066_s2 = inlined_call_operand.vmem [shape: f32[1,128], index: 2, kind: input, shape index: {}]   ;;  %s2067_s3 = inlined_call_operand.hbm [shape: f32[64,256], index: 3, kind: input, shape index: {}]   ;;  %s2068_s4 = inlined_call_operand.vmem [shape: f32[1,128], index: 4, kind: input, shape index: {}]   ;;  %s2069_s5 = inlined_call_operand.vmem [shape: f32[32,4], index: 5, kind: input, shape index: {}]   ;;  %s2070_s6 = inlined_call_operand.vmem [shape: f32[1,4], index: 6, kind: input, shape index: {}]   ;;  %s2071_s7 = inlined_call_operand.hbm [shape: f32[2,4], index: 7, kind: output, shape index: {}]  }
   0x1   :  { %13 = vsyncpa [#allocation4], 0  ;;  %s1768_s24 = smov [#allocation2]   ;;  %s1720_s28 = scalar_lea.hbm %s2067_s3, 2048 }
   0x2   :  { %s25_s25 = sshll.u32 %s1768_s24, 4  ;;  %p1721_p0 = scmp.ne.s32.totalorder %s2067_s3, %s1720_s28  ;;  %s26_s25 = int_to_ptr.vmem [resolvable:$true] %s25_s25 }
   0x3   :  { %p1724_p1 = scmp.lt.u32.totalorder %s1720_s28, %s2067_s3 }
   0x5   :  { %p1726_p2 = pnand %p1724_p1, %p1721_p0 }
   0x7   :  { %1729 = shalt.err (!%p1726_p2)
}
   0x8   :  { %s1730_s10 = scalar_lea.vmem %s26_s25, 2048  ;;  %p1735_p4 = scmp.lt.s32.totalorder %s26_s25, %s26_s25 }
   0x9   :  { %p1731_p3 = scmp.ne.s32.totalorder %s26_s25, %s1730_s10  ;;  %p1736_p5 = scmp.lt.s32.totalorder %s1730_s10, %s1730_s10 }
   0xb   :  { %p1737_p6 = por %p1736_p5, %p1735_p4 }
   0xd   :  { %p1738_p7 = pnand %p1737_p6, %p1731_p3 }
   0xf   :  { %1741 = shalt.err (!%p1738_p7)
}
  0x10   :  { %s1769_s11 = smov 256   ;;  %s1770_s12 = smov 16  }
  0x11   :  { %31 = dma.hbm_to_vmem [thread:$0]  %s2067_s3, 2048, %s26_s25, [#allocation3], %s1769_s11, %s1769_s11, %s1770_s12  }
  0x12   :  { %1764 = dma.done.wait [#allocation3], 2048  }
  0x13   :  { %1765 = vsyncadd [#allocation3], 4294965248  ;;  %vm51_vm0 = vcmask 64512   ;;  %v43_v0 = vld [vmem:[%s2065_s1] sm:$0xff]  ;;  %v42_v2 = vld [vmem:[%s2064_s0 + $0x8] sm:$0xff]  ;;  %v1772_v44 = vmov 0.0  }
  0x14   :  { %v41_v1 = vld [vmem:[%s2064_s0] sm:$0xff]  ;;  %1449 = vmatprep.subr.mxu0 %v43_v0  ;;  %s1771_s0 = smov 32   ;;  %v134_v19 = vld [vmem:[#allocation2 + $0x8] sm:$0xff]  ;;  %v136_v20 = vld [vmem:[#allocation2 + $0x18] sm:$0xff]  ;;  %255 = vmatprep.mubr.f32.mxu1 %v1772_v44  ;;  %s1773_s1 = smov 64   ;;  %vm185_vm1 = vcmask 261120  }
  0x15   :  { %1451 = vmatprep.mubr.msk.f32.mxu0 %vm51_vm0, %v41_v1  ;;  %1450 = vmatpush3.msra.mxu0 %v43_v0  ;;  %v1386_v3 = vld [vmem:[%s2066_s2] ss:$0 sm:$0xff]  ;;  %v1852_v22 = vpack.c.bf16 %v136_v20, %v134_v19  ;;  %v135_v23 = vld [vmem:[#allocation2 + $0x10] sm:$0xff]  ;;  %v138_v24 = vld [vmem:[#allocation2 + $0x28] sm:$0xff]  ;;  %vm187_vm2 = vcmask 523264   ;;  %vm1776_vm3 = vmmov 0  }
  0x16   :  { %1452 = vmatmul.mubr.msk.f32.vlgmr.msra.gmra.mrb[0].mxu0 %vm51_vm0, %v42_v2  ;;  %v133_v21 = vld [vmem:[#allocation2] sm:$0xff]  ;;  %v140_v25 = vld [vmem:[#allocation2 + $0x38] sm:$0xff]  ;;  %v139_v29 = vld [vmem:[#allocation2 + $0x30] sm:$0xff]  ;;  %s1777_s10 = smov [#allocation5]   ;;  %vm1369_vm4 = vcmask 25600  }
  0x17   :  { %v1854_v26 = vpack.c.bf16 %v135_v23, %v133_v21  ;;  %v1856_v27 = vpack.c.bf16 %v140_v25, %v138_v24  ;;  %v137_v28 = vld [vmem:[#allocation2 + $0x20] sm:$0xff]  ;;  %v142_v30 = vld [vmem:[#allocation2 + $0x48] sm:$0xff]  ;;  %1485 = vmatprep.subr.bf16.mxu1 %v1852_v22  ;;  %v144_v31 = vld [vmem:[#allocation2 + $0x58] sm:$0xff]  ;;  %1501 = vmatprep.subr.bf16.mxu0 %v1852_v22 }
  0x18   :  { %v1861_v32 = vpack.c.bf16 %v139_v29, %v137_v28  ;;  %v1865_v33 = vpack.c.bf16 %v144_v31, %v142_v30  ;;  %v141_v34 = vld [vmem:[#allocation2 + $0x40] sm:$0xff]  ;;  %v143_v35 = vld [vmem:[#allocation2 + $0x50] sm:$0xff]  ;;  %v146_v36 = vld [vmem:[#allocation2 + $0x68] sm:$0xff]  ;;  %398 = vmatprep.mubr.f32.mxu0 %v1772_v44 }
  0x19   :  { %1487 = vmatpush1.bf16.msra.mxu1 %v1854_v26  ;;  %1503 = vmatpush1.bf16.msra.mxu0 %v1854_v26  ;;  %v148_v37 = vld [vmem:[#allocation2 + $0x78] sm:$0xff]  ;;  %v1869_v38 = vpack.c.bf16 %v143_v35, %v141_v34  ;;  %v145_v40 = vld [vmem:[#allocation2 + $0x60] sm:$0xff]  ;;  %v147_v41 = vld [vmem:[#allocation2 + $0x70] sm:$0xff] }
  0x1a   :  { %1489 = vmatprep.subr.bf16.mxu1 %v1856_v27  ;;  %1505 = vmatprep.subr.bf16.mxu0 %v1856_v27  ;;  %v1873_v39 = vpack.c.bf16 %v148_v37, %v146_v36  ;;  %v1878_v43 = vpack.c.bf16 %v147_v41, %v145_v40  ;;  %v1904_v49 = vld [vmem:[%s2068_s4] ss:$0 sm:$0xff]  ;;  %s1774_s4 = smov 96  }
  0x1d   :  { %1491 = vmatpush1.bf16.msra.mxu1 %v1861_v32  ;;  %1507 = vmatpush1.bf16.msra.mxu0 %v1861_v32 }
  0x1e   :  { %1493 = vmatprep.subr.bf16.mxu1 %v1865_v33  ;;  %1509 = vmatprep.subr.bf16.mxu0 %v1865_v33 }
  0x21   :  { %1495 = vmatpush1.bf16.msra.mxu1 %v1869_v38  ;;  %1511 = vmatpush1.bf16.msra.mxu0 %v1869_v38 }
  0x22   :  { %1497 = vmatprep.subr.bf16.mxu1 %v1873_v39  ;;  %1513 = vmatprep.subr.bf16.mxu0 %v1873_v39 }
  0x25   :  { %1499 = vmatpush1.bf16.msra.mxu1 %v1878_v43  ;;  %1515 = vmatpush1.bf16.msra.mxu0 %v1878_v43 }
  0x26   :  { %1517 = vmatprep.subr.bf16.mxu1 %v1852_v22  ;;  %1533 = vmatprep.subr.bf16.mxu0 %v1852_v22 }
  0xe9   :  { %v1453_v4 = vpop.f32.mrb[0].mxu0 }
  0xea   :  { %v1842_v5 = vadd.f32 %v1453_v4, %v1386_v3  ;;  %v124_v6 = vpop.f32.mrb[1].mxu0 }
  0xeb   :  { %v1844_v7 = vadd.f32 %v1386_v3, %v124_v6 }
  0xed   :  { %v1390_v8 = vmul.f32 -1.442695, %v1844_v7 }
  0xef   :  { %1624 = vpow2.f32 %v1390_v8 }
  0xf9   :  { %v1625_v9 = vpop.eup %1624 }
  0xfa   :  { %v159_v10 = vadd.f32 1.0, %v1625_v9 }
  0xfc   :  { %1626 = vrcp.f32 %v159_v10 }
 0x106   :  { %v1627_v11 = vpop.eup %1626 }
 0x107   :  { %v162_v12 = vmul.f32 2.0, %v1627_v11  ;;  %v164_v16 = vmul.f32 0.0, %v1627_v11 }
 0x109   :  { %v1391_v13 = vadd.f32 -1.0, %v162_v12 }
 0x10b   :  { %166 = vrot.lane.b32.xlu0 %v1391_v13, %s1771_s0 }
 0x17d   :  { %v167_v14 = vpop.permute.xlu0 %166 }
 0x17e   :  { %v169_v15 = vmul.f32 %v1627_v11, %v167_v14 }
 0x180   :  { %171 = vrot.lane.b32.xlu0 %v169_v15, %s1771_s0 }
 0x1f2   :  { %v172_v17 = vpop.permute.xlu0 %171 }
 0x1f3   :  { %v1849_v18 = vadd.f32 %v172_v17, %v164_v16 }
 0x1f5   :  { %1628 = vtanh.f32 %v1849_v18  ;;  %v276_v9 = vrot.slane %v1849_v18, 6 }
 0x1ff   :  { %v1629_v42 = vpop.eup %1628 }
 0x200   :  { %177 = vrot.lane.b32.xlu1 %v1629_v42, %s1771_s0 }
 0x272   :  { %v178_v45 = vpop.permute.xlu1 %177 }
 0x273   :  { %v180_v46 = vmul.f32 %v1627_v11, %v178_v45 }
 0x275   :  { %182 = vrot.lane.b32.xlu1 %v180_v46, %s1773_s1 }
 0x2e7   :  { %v183_v47 = vpop.permute.xlu1 %182 }
 0x2e8   :  { %v186_v48 = vsel %vm185_vm1, %v183_v47, 0.0 }
 0x2e9   :  { %1392 = vmatmul.mubr.msk.f32.vlgmr.msra.gmra.mrb[0].mxu1 %vm187_vm2, %v186_v48 }
 0x2ea   :  { %1519 = vmatpush1.bf16.msra.mxu1 %v1854_v26  ;;  %541 = vmatprep.mubr.f32.mxu1 %v1772_v44 }
 0x2eb   :  { %1521 = vmatprep.subr.bf16.mxu1 %v1856_v27 }
 0x2ee   :  { %1523 = vmatpush1.bf16.msra.mxu1 %v1861_v32 }
 0x2ef   :  { %1525 = vmatprep.subr.bf16.mxu1 %v1865_v33 }
 0x2f2   :  { %1527 = vmatpush1.bf16.msra.mxu1 %v1869_v38 }
 0x2f3   :  { %1529 = vmatprep.subr.bf16.mxu1 %v1873_v39 }
 0x2f6   :  { %1531 = vmatpush1.bf16.msra.mxu1 %v1878_v43 }
 0x2f7   :  { %1549 = vmatprep.subr.bf16.mxu1 %v1852_v22 }
 0x3bc   :  { %v257_v50 = vpop.f32.mrb[0].mxu1 }
 0x3bd   :  { %v263_v51 = vrot.slane %v257_v50, 6  ;;  %v259_v52 = vpop.f32.mrb[1].mxu1 }
 0x3be   :  { %v266_v53 = vadd.f32 %v1904_v49, %v259_v52 }
 0x3bf   :  { %v265_v54 = vadd.f32 %v263_v51, %v1844_v7 }
 0x3c0   :  { %v1395_v55 = vmul.f32 -1.442695, %v266_v53 }
 0x3c1   :  { %v1393_v56 = vmul.f32 -1.442695, %v265_v54 }
 0x3c2   :  { %1630 = vpow2.f32 %v1395_v55 }
 0x3c3   :  { %1632 = vpow2.f32 %v1393_v56 }
 0x3cc   :  { %v1631_v57 = vpop.eup %1630 }
 0x3cd   :  { %v1633_v58 = vpop.eup %1632  ;;  %v298_v59 = vadd.f32 1.0, %v1631_v57 }
 0x3ce   :  { %v270_v60 = vadd.f32 1.0, %v1633_v58 }
 0x3cf   :  { %1634 = vrcp.f32 %v298_v59 }
 0x3d0   :  { %1636 = vrcp.f32 %v270_v60 }
 0x3d9   :  { %v1635_v61 = vpop.eup %1634 }
 0x3da   :  { %v1637_v62 = vpop.eup %1636  ;;  %v301_v63 = vmul.f32 2.0, %v1635_v61  ;;  %v303_v10 = vmul.f32 0.0, %v1635_v61 }
 0x3db   :  { %v273_v0 = vmul.f32 2.0, %v1637_v62  ;;  %v278_v12 = vmul.f32 %v1637_v62, %v276_v9 }
 0x3dc   :  { %v1396_v1 = vadd.f32 -1.0, %v301_v63 }
 0x3dd   :  { %v1394_v2 = vadd.f32 -1.0, %v273_v0 }
 0x3de   :  { %305 = vrot.lane.b32.xlu0 %v1396_v1, %s1771_s0 }
 0x3df   :  { %280 = vrot.lane.b32.xlu1 %v1394_v2, %s1771_s0 }
 0x450   :  { %v306_v3 = vpop.permute.xlu0 %305 }
 0x451   :  { %v308_v4 = vmul.f32 %v1635_v61, %v306_v3  ;;  %v281_v6 = vpop.permute.xlu1 %280 }
 0x452   :  { %v283_v8 = vmul.f32 %v1637_v62, %v281_v6 }
 0x453   :  { %310 = vrot.lane.b32.xlu0 %v308_v4, %s1771_s0 }
 0x454   :  { %285 = vrot.lane.b32.xlu1 %v283_v8, %s1771_s0 }
 0x4c5   :  { %v311_v11 = vpop.permute.xlu0 %310 }
 0x4c6   :  { %v313_v13 = vadd.f32 %v311_v11, %v303_v10  ;;  %v286_v14 = vpop.permute.xlu1 %285 }
 0x4c7   :  { %v288_v15 = vadd.f32 %v286_v14, %v278_v12 }
 0x4c8   :  { %1638 = vtanh.f32 %v313_v13 }
 0x4c9   :  { %1640 = vtanh.f32 %v288_v15  ;;  %v419_v58 = vrot.slane %v288_v15, 6 }
 0x4d2   :  { %v1639_v16 = vpop.eup %1638 }
 0x4d3   :  { %v1641_v17 = vpop.eup %1640  ;;  %316 = vrot.lane.b32.xlu0 %v1639_v16, %s1771_s0 }
 0x4d4   :  { %291 = vrot.lane.b32.xlu1 %v1641_v17, %s1771_s0 }
 0x545   :  { %v317_v19 = vpop.permute.xlu0 %316 }
 0x546   :  { %v319_v20 = vmul.f32 %v1635_v61, %v317_v19  ;;  %v292_v21 = vpop.permute.xlu1 %291 }
 0x547   :  { %v294_v23 = vmul.f32 %v1637_v62, %v292_v21 }
 0x548   :  { %v325_v24 = vrot.slane %v319_v20, 6 }
 0x549   :  { %321 = vrot.lane.b32.xlu0 %v294_v23, %s1773_s1 }
 0x54a   :  { %326 = vrot.lane.b32.xlu1 %v325_v24, %s1774_s4 }
 0x5bb   :  { %v322_v18 = vpop.permute.xlu0 %321 }
 0x5bc   :  { %v327_v25 = vpop.permute.xlu1 %326 }
 0x5bd   :  { %v329_v28 = vsel %vm185_vm1, %v322_v18, %v327_v25 }
 0x5be   :  { %v331_v29 = vrot.slane %v329_v28, 2 }
 0x5c0   :  { %1397 = vmatmul.mubr.msk.f32.vlgmr.msra.gmra.mrb[2].mxu0 %vm187_vm2, %v331_v29 }
 0x5c1   :  { %1535 = vmatpush1.bf16.msra.mxu0 %v1854_v26  ;;  %684 = vmatprep.mubr.f32.mxu0 %v1772_v44 }
 0x5c2   :  { %1537 = vmatprep.subr.bf16.mxu0 %v1856_v27 }
 0x5c5   :  { %1539 = vmatpush1.bf16.msra.mxu0 %v1861_v32 }
 0x5c6   :  { %1541 = vmatprep.subr.bf16.mxu0 %v1865_v33 }
 0x5c9   :  { %1543 = vmatpush1.bf16.msra.mxu0 %v1869_v38 }
 0x5ca   :  { %1545 = vmatprep.subr.bf16.mxu0 %v1873_v39 }
 0x5cd   :  { %1547 = vmatpush1.bf16.msra.mxu0 %v1878_v43 }
 0x5ce   :  { %1565 = vmatprep.subr.bf16.mxu0 %v1852_v22 }
 0x693   :  { %v400_v30 = vpop.f32.mrb[2].mxu0 }
 0x694   :  { %v406_v31 = vrot.slane %v400_v30, 4  ;;  %v402_v34 = vpop.f32.mrb[3].mxu0 }
 0x695   :  { %v409_v35 = vadd.f32 %v1904_v49, %v402_v34 }
 0x696   :  { %v408_v36 = vadd.f32 %v406_v31, %v1844_v7 }
 0x697   :  { %v1400_v37 = vmul.f32 -1.442695, %v409_v35 }
 0x698   :  { %v1398_v40 = vmul.f32 -1.442695, %v408_v36 }
 0x699   :  { %1642 = vpow2.f32 %v1400_v37 }
 0x69a   :  { %1644 = vpow2.f32 %v1398_v40 }
 0x6a3   :  { %v1643_v41 = vpop.eup %1642 }
 0x6a4   :  { %v1645_v42 = vpop.eup %1644  ;;  %v441_v45 = vadd.f32 1.0, %v1643_v41 }
 0x6a5   :  { %v413_v46 = vadd.f32 1.0, %v1645_v42 }
 0x6a6   :  { %1646 = vrcp.f32 %v441_v45 }
 0x6a7   :  { %1648 = vrcp.f32 %v413_v46 }
 0x6b0   :  { %v1647_v47 = vpop.eup %1646 }
 0x6b1   :  { %v1649_v48 = vpop.eup %1648  ;;  %v444_v50 = vmul.f32 2.0, %v1647_v47  ;;  %v446_v59 = vmul.f32 %v1647_v47, %v313_v13 }
 0x6b2   :  { %v416_v51 = vmul.f32 2.0, %v1649_v48  ;;  %v421_v61 = vmul.f32 %v1649_v48, %v419_v58 }
 0x6b3   :  { %v1401_v52 = vadd.f32 -1.0, %v444_v50 }
 0x6b4   :  { %v1399_v53 = vadd.f32 -1.0, %v416_v51 }
 0x6b5   :  { %448 = vrot.lane.b32.xlu0 %v1401_v52, %s1771_s0 }
 0x6b6   :  { %423 = vrot.lane.b32.xlu1 %v1399_v53, %s1771_s0 }
 0x727   :  { %v449_v54 = vpop.permute.xlu0 %448 }
 0x728   :  { %v451_v55 = vmul.f32 %v1647_v47, %v449_v54  ;;  %v424_v56 = vpop.permute.xlu1 %423 }
 0x729   :  { %v426_v57 = vmul.f32 %v1649_v48, %v424_v56 }
 0x72a   :  { %453 = vrot.lane.b32.xlu0 %v451_v55, %s1771_s0 }
 0x72b   :  { %428 = vrot.lane.b32.xlu1 %v426_v57, %s1771_s0 }
 0x79c   :  { %v454_v60 = vpop.permute.xlu0 %453 }
 0x79d   :  { %v456_v62 = vadd.f32 %v454_v60, %v446_v59  ;;  %v429_v63 = vpop.permute.xlu1 %428 }
 0x79e   :  { %v431_v0 = vadd.f32 %v429_v63, %v421_v61 }
 0x79f   :  { %1650 = vtanh.f32 %v456_v62 }
 0x7a0   :  { %1652 = vtanh.f32 %v431_v0  ;;  %v562_v41 = vrot.slane %v431_v0, 6 }
 0x7a9   :  { %v1651_v1 = vpop.eup %1650 }
 0x7aa   :  { %v1653_v2 = vpop.eup %1652  ;;  %459 = vrot.lane.b32.xlu0 %v1651_v1, %s1771_s0 }
 0x7ab   :  { %434 = vrot.lane.b32.xlu1 %v1653_v2, %s1771_s0 }
 0x81c   :  { %v460_v3 = vpop.permute.xlu0 %459 }
 0x81d   :  { %v462_v4 = vmul.f32 %v1647_v47, %v460_v3  ;;  %v435_v6 = vpop.permute.xlu1 %434 }
 0x81e   :  { %v437_v8 = vmul.f32 %v1649_v48, %v435_v6 }
 0x81f   :  { %v468_v9 = vrot.slane %v462_v4, 4 }
 0x820   :  { %464 = vrot.lane.b32.xlu0 %v437_v8, %s1773_s1 }
 0x821   :  { %469 = vrot.lane.b32.xlu1 %v468_v9, %s1774_s4 }
 0x892   :  { %v465_v10 = vpop.permute.xlu0 %464 }
 0x893   :  { %v470_v11 = vpop.permute.xlu1 %469 }
 0x894   :  { %v472_v12 = vsel %vm185_vm1, %v465_v10, %v470_v11 }
 0x895   :  { %v474_v13 = vrot.slane %v472_v12, 4 }
 0x897   :  { %1402 = vmatmul.mubr.msk.f32.vlgmr.msra.gmra.mrb[2].mxu1 %vm187_vm2, %v474_v13 }
 0x898   :  { %1551 = vmatpush1.bf16.msra.mxu1 %v1854_v26  ;;  %822 = vmatprep.mubr.f32.mxu1 %v1772_v44 }
 0x899   :  { %1553 = vmatprep.subr.bf16.mxu1 %v1856_v27 }
 0x89c   :  { %1555 = vmatpush1.bf16.msra.mxu1 %v1861_v32 }
 0x89d   :  { %1557 = vmatprep.subr.bf16.mxu1 %v1865_v33 }
 0x8a0   :  { %1559 = vmatpush1.bf16.msra.mxu1 %v1869_v38 }
 0x8a1   :  { %1561 = vmatprep.subr.bf16.mxu1 %v1873_v39 }
 0x8a4   :  { %1563 = vmatpush1.bf16.msra.mxu1 %v1878_v43 }
 0x8a5   :  { %1581 = vmatprep.subr.bf16.mxu1 %v1852_v22 }
 0x96a   :  { %v543_v14 = vpop.f32.mrb[2].mxu1 }
 0x96b   :  { %v549_v15 = vrot.slane %v543_v14, 2  ;;  %v545_v16 = vpop.f32.mrb[3].mxu1 }
 0x96c   :  { %v552_v17 = vadd.f32 %v1904_v49, %v545_v16 }
 0x96d   :  { %v551_v19 = vadd.f32 %v549_v15, %v1844_v7 }
 0x96e   :  { %v1405_v20 = vmul.f32 -1.442695, %v552_v17 }
 0x96f   :  { %v1403_v21 = vmul.f32 -1.442695, %v551_v19 }
 0x970   :  { %1654 = vpow2.f32 %v1405_v20 }
 0x971   :  { %1656 = vpow2.f32 %v1403_v21 }
 0x97a   :  { %v1655_v23 = vpop.eup %1654 }
 0x97b   :  { %v1657_v24 = vpop.eup %1656  ;;  %v584_v18 = vadd.f32 1.0, %v1655_v23 }
 0x97c   :  { %v556_v25 = vadd.f32 1.0, %v1657_v24 }
 0x97d   :  { %1658 = vrcp.f32 %v584_v18 }
 0x97e   :  { %1660 = vrcp.f32 %v556_v25 }
 0x987   :  { %v1659_v28 = vpop.eup %1658 }
 0x988   :  { %v1661_v29 = vpop.eup %1660  ;;  %v587_v30 = vmul.f32 2.0, %v1659_v28  ;;  %v589_v42 = vmul.f32 %v1659_v28, %v456_v62 }
 0x989   :  { %v559_v31 = vmul.f32 2.0, %v1661_v29  ;;  %v564_v46 = vmul.f32 %v1661_v29, %v562_v41 }
 0x98a   :  { %v1406_v34 = vadd.f32 -1.0, %v587_v30 }
 0x98b   :  { %v1404_v35 = vadd.f32 -1.0, %v559_v31 }
 0x98c   :  { %591 = vrot.lane.b32.xlu0 %v1406_v34, %s1771_s0 }
 0x98d   :  { %566 = vrot.lane.b32.xlu1 %v1404_v35, %s1771_s0 }
 0x9fe   :  { %v592_v7 = vpop.permute.xlu0 %591 }
 0x9ff   :  { %v594_v36 = vmul.f32 %v1659_v28, %v592_v7  ;;  %v567_v37 = vpop.permute.xlu1 %566 }
 0xa00   :  { %v569_v40 = vmul.f32 %v1661_v29, %v567_v37 }
 0xa01   :  { %596 = vrot.lane.b32.xlu0 %v594_v36, %s1771_s0 }
 0xa02   :  { %571 = vrot.lane.b32.xlu1 %v569_v40, %s1771_s0 }
 0xa73   :  { %v597_v45 = vpop.permute.xlu0 %596 }
 0xa74   :  { %v599_v47 = vadd.f32 %v597_v45, %v589_v42  ;;  %v572_v48 = vpop.permute.xlu1 %571 }
 0xa75   :  { %v574_v50 = vadd.f32 %v572_v48, %v564_v46 }
 0xa76   :  { %1662 = vtanh.f32 %v599_v47 }
 0xa77   :  { %1664 = vtanh.f32 %v574_v50  ;;  %v702_v21 = vrot.slane %v574_v50, 6 }
 0xa80   :  { %v1663_v51 = vpop.eup %1662 }
 0xa81   :  { %v1665_v52 = vpop.eup %1664  ;;  %602 = vrot.lane.b32.xlu0 %v1663_v51, %s1771_s0 }
 0xa82   :  { %577 = vrot.lane.b32.xlu1 %v1665_v52, %s1771_s0 }
 0xaf3   :  { %v603_v53 = vpop.permute.xlu0 %602 }
 0xaf4   :  { %v605_v54 = vmul.f32 %v1659_v28, %v603_v53  ;;  %v578_v55 = vpop.permute.xlu1 %577 }
 0xaf5   :  { %v580_v56 = vmul.f32 %v1661_v29, %v578_v55 }
 0xaf6   :  { %v611_v57 = vrot.slane %v605_v54, 2 }
 0xaf7   :  { %607 = vrot.lane.b32.xlu0 %v580_v56, %s1773_s1 }
 0xaf8   :  { %612 = vrot.lane.b32.xlu1 %v611_v57, %s1774_s4 }
 0xb69   :  { %v608_v58 = vpop.permute.xlu0 %607 }
 0xb6a   :  { %v613_v59 = vpop.permute.xlu1 %612 }
 0xb6b   :  { %v615_v60 = vsel %vm185_vm1, %v608_v58, %v613_v59 }
 0xb6c   :  { %v617_v61 = vrot.slane %v615_v60, 6 }
 0xb6e   :  { %1407 = vmatmul.mubr.msk.f32.vlgmr.msra.gmra.mrb[4].mxu0 %vm187_vm2, %v617_v61 }
 0xb6f   :  { %1567 = vmatpush1.bf16.msra.mxu0 %v1854_v26  ;;  %965 = vmatprep.mubr.f32.mxu0 %v1772_v44 }
 0xb70   :  { %1569 = vmatprep.subr.bf16.mxu0 %v1856_v27 }
 0xb73   :  { %1571 = vmatpush1.bf16.msra.mxu0 %v1861_v32 }
 0xb74   :  { %1573 = vmatprep.subr.bf16.mxu0 %v1865_v33 }
 0xb77   :  { %1575 = vmatpush1.bf16.msra.mxu0 %v1869_v38 }
 0xb78   :  { %1577 = vmatprep.subr.bf16.mxu0 %v1873_v39 }
 0xb7b   :  { %1579 = vmatpush1.bf16.msra.mxu0 %v1878_v43 }
 0xc41   :  { %v686_v62 = vpop.f32.mrb[4].mxu0 }
 0xc42   :  { %v691_v63 = vadd.f32 %v686_v62, %v1842_v5  ;;  %v688_v0 = vpop.f32.mrb[5].mxu0 }
 0xc43   :  { %v692_v1 = vadd.f32 %v1904_v49, %v688_v0 }
 0xc44   :  { %v1408_v2 = vmul.f32 -1.442695, %v691_v63 }
 0xc45   :  { %v1410_v3 = vmul.f32 -1.442695, %v692_v1 }
 0xc46   :  { %1666 = vpow2.f32 %v1408_v2 }
 0xc47   :  { %1668 = vpow2.f32 %v1410_v3 }
 0xc50   :  { %v1667_v4 = vpop.eup %1666 }
 0xc51   :  { %v1669_v6 = vpop.eup %1668  ;;  %v696_v8 = vadd.f32 1.0, %v1667_v4 }
 0xc52   :  { %v724_v9 = vadd.f32 1.0, %v1669_v6 }
 0xc53   :  { %1670 = vrcp.f32 %v696_v8 }
 0xc54   :  { %1672 = vrcp.f32 %v724_v9 }
 0xc5d   :  { %v1671_v10 = vpop.eup %1670 }
 0xc5e   :  { %v1673_v11 = vpop.eup %1672  ;;  %v699_v12 = vmul.f32 2.0, %v1671_v10  ;;  %v704_v23 = vmul.f32 %v1671_v10, %v702_v21 }
 0xc5f   :  { %v727_v13 = vmul.f32 2.0, %v1673_v11  ;;  %v729_v18 = vmul.f32 %v1673_v11, %v599_v47 }
 0xc60   :  { %v1409_v14 = vadd.f32 -1.0, %v699_v12 }
 0xc61   :  { %v1411_v15 = vadd.f32 -1.0, %v727_v13 }
 0xc62   :  { %706 = vrot.lane.b32.xlu0 %v1409_v14, %s1771_s0 }
 0xc63   :  { %731 = vrot.lane.b32.xlu1 %v1411_v15, %s1771_s0 }
 0xcd4   :  { %v707_v16 = vpop.permute.xlu0 %706 }
 0xcd5   :  { %v709_v17 = vmul.f32 %v1671_v10, %v707_v16  ;;  %v732_v19 = vpop.permute.xlu1 %731 }
 0xcd6   :  { %v734_v20 = vmul.f32 %v1673_v11, %v732_v19 }
 0xcd7   :  { %711 = vrot.lane.b32.xlu0 %v709_v17, %s1771_s0 }
 0xcd8   :  { %736 = vrot.lane.b32.xlu1 %v734_v20, %s1771_s0 }
 0xd49   :  { %v712_v24 = vpop.permute.xlu0 %711 }
 0xd4a   :  { %v714_v25 = vadd.f32 %v712_v24, %v704_v23  ;;  %v737_v28 = vpop.permute.xlu1 %736 }
 0xd4b   :  { %v739_v29 = vadd.f32 %v737_v28, %v729_v18 }
 0xd4c   :  { %1674 = vtanh.f32 %v714_v25  ;;  %v843_v62 = vrot.slane %v714_v25, 6 }
 0xd4d   :  { %1676 = vtanh.f32 %v739_v29 }
 0xd56   :  { %v1675_v30 = vpop.eup %1674 }
 0xd57   :  { %v1677_v31 = vpop.eup %1676  ;;  %717 = vrot.lane.b32.xlu0 %v1675_v30, %s1771_s0 }
 0xd58   :  { %742 = vrot.lane.b32.xlu1 %v1677_v31, %s1771_s0 }
 0xdc9   :  { %v718_v34 = vpop.permute.xlu0 %717 }
 0xdca   :  { %v720_v35 = vmul.f32 %v1671_v10, %v718_v34  ;;  %v743_v7 = vpop.permute.xlu1 %742 }
 0xdcb   :  { %v745_v36 = vmul.f32 %v1673_v11, %v743_v7 }
 0xdcc   :  { %747 = vrot.lane.b32.xlu0 %v720_v35, %s1773_s1 }
 0xdcd   :  { %751 = vrot.lane.b32.xlu1 %v745_v36, %s1774_s4 }
 0xe3e   :  { %v748_v37 = vpop.permute.xlu0 %747 }
 0xe3f   :  { %v752_v40 = vpop.permute.xlu1 %751 }
 0xe40   :  { %v754_v41 = vsel %vm185_vm1, %v748_v37, %v752_v40 }
 0xe41   :  { %1412 = vmatmul.mubr.msk.f32.vlgmr.msra.gmra.mrb[4].mxu1 %vm187_vm2, %v754_v41 }
 0xe42   :  { %1583 = vmatpush1.bf16.msra.mxu1 %v1854_v26  ;;  %1108 = vmatprep.mubr.f32.mxu1 %v1772_v44 }
 0xe43   :  { %1585 = vmatprep.subr.bf16.mxu1 %v1856_v27 }
 0xe46   :  { %1587 = vmatpush1.bf16.msra.mxu1 %v1861_v32 }
 0xe47   :  { %1589 = vmatprep.subr.bf16.mxu1 %v1865_v33 }
 0xe4a   :  { %1591 = vmatpush1.bf16.msra.mxu1 %v1869_v38 }
 0xe4b   :  { %1593 = vmatprep.subr.bf16.mxu1 %v1873_v39 }
 0xe4e   :  { %1595 = vmatpush1.bf16.msra.mxu1 %v1878_v43 }
 0xf14   :  { %v824_v42 = vpop.f32.mrb[4].mxu1 }
 0xf15   :  { %v830_v45 = vrot.slane %v824_v42, 6  ;;  %v826_v46 = vpop.f32.mrb[5].mxu1 }
 0xf16   :  { %v833_v47 = vadd.f32 %v1904_v49, %v826_v46 }
 0xf17   :  { %v832_v26 = vadd.f32 %v830_v45, %v1842_v5 }
 0xf18   :  { %v1415_v48 = vmul.f32 -1.442695, %v833_v47 }
 0xf19   :  { %v1413_v50 = vmul.f32 -1.442695, %v832_v26 }
 0xf1a   :  { %1678 = vpow2.f32 %v1415_v48 }
 0xf1b   :  { %1680 = vpow2.f32 %v1413_v50 }
 0xf24   :  { %v1679_v32 = vpop.eup %1678 }
 0xf25   :  { %v1681_v51 = vpop.eup %1680  ;;  %v865_v52 = vadd.f32 1.0, %v1679_v32 }
 0xf26   :  { %v837_v53 = vadd.f32 1.0, %v1681_v51 }
 0xf27   :  { %1682 = vrcp.f32 %v865_v52 }
 0xf28   :  { %1684 = vrcp.f32 %v837_v53 }
 0xf31   :  { %v1683_v38 = vpop.eup %1682 }
 0xf32   :  { %v1685_v54 = vpop.eup %1684  ;;  %v868_v43 = vmul.f32 2.0, %v1683_v38  ;;  %v870_v63 = vmul.f32 %v1683_v38, %v739_v29 }
 0xf33   :  { %v840_v55 = vmul.f32 2.0, %v1685_v54  ;;  %v845_v1 = vmul.f32 %v1685_v54, %v843_v62 }
 0xf34   :  { %v1416_v56 = vadd.f32 -1.0, %v868_v43 }
 0xf35   :  { %v1414_v57 = vadd.f32 -1.0, %v840_v55 }
 0xf36   :  { %872 = vrot.lane.b32.xlu0 %v1416_v56, %s1771_s0 }
 0xf37   :  { %847 = vrot.lane.b32.xlu1 %v1414_v57, %s1771_s0 }
 0xfa8   :  { %v873_v58 = vpop.permute.xlu0 %872 }
 0xfa9   :  { %v875_v59 = vmul.f32 %v1683_v38, %v873_v58  ;;  %v848_v60 = vpop.permute.xlu1 %847 }
 0xfaa   :  { %v850_v61 = vmul.f32 %v1685_v54, %v848_v60 }
 0xfab   :  { %877 = vrot.lane.b32.xlu0 %v875_v59, %s1771_s0 }
 0xfac   :  { %852 = vrot.lane.b32.xlu1 %v850_v61, %s1771_s0 }
0x101d   :  { %v878_v0 = vpop.permute.xlu0 %877 }
0x101e   :  { %v880_v2 = vadd.f32 %v878_v0, %v870_v63  ;;  %v853_v3 = vpop.permute.xlu1 %852 }
0x101f   :  { %v855_v4 = vadd.f32 %v853_v3, %v845_v1 }
0x1020   :  { %1686 = vtanh.f32 %v880_v2 }
0x1021   :  { %1688 = vtanh.f32 %v855_v4  ;;  %v986_v47 = vrot.slane %v855_v4, 6 }
0x102a   :  { %v1687_v6 = vpop.eup %1686 }
0x102b   :  { %v1689_v8 = vpop.eup %1688  ;;  %883 = vrot.lane.b32.xlu0 %v1687_v6, %s1771_s0 }
0x102c   :  { %858 = vrot.lane.b32.xlu1 %v1689_v8, %s1771_s0 }
0x109d   :  { %v884_v9 = vpop.permute.xlu0 %883 }
0x109e   :  { %v886_v10 = vmul.f32 %v1683_v38, %v884_v9  ;;  %v859_v11 = vpop.permute.xlu1 %858 }
0x109f   :  { %v861_v12 = vmul.f32 %v1685_v54, %v859_v11 }
0x10a0   :  { %v892_v13 = vrot.slane %v886_v10, 6 }
0x10a1   :  { %888 = vrot.lane.b32.xlu0 %v861_v12, %s1773_s1 }
0x10a2   :  { %893 = vrot.lane.b32.xlu1 %v892_v13, %s1774_s4 }
0x1113   :  { %v889_v14 = vpop.permute.xlu0 %888 }
0x1114   :  { %v894_v15 = vpop.permute.xlu1 %893 }
0x1115   :  { %v896_v16 = vsel %vm185_vm1, %v889_v14, %v894_v15 }
0x1116   :  { %v898_v17 = vrot.slane %v896_v16, 2 }
0x1118   :  { %1417 = vmatmul.mubr.msk.f32.vlgmr.msra.gmra.mrb[6].mxu0 %vm187_vm2, %v898_v17 }
0x1119   :  { %1470 = vmatprep.mubr.msk.f32.mxu0 %vm1776_vm3, %v1772_v44 }
0x11eb   :  { %v967_v19 = vpop.f32.mrb[6].mxu0 }
0x11ec   :  { %v973_v20 = vrot.slane %v967_v19, 4  ;;  %v969_v21 = vpop.f32.mrb[7].mxu0 }
0x11ed   :  { %v976_v23 = vadd.f32 %v1904_v49, %v969_v21 }
0x11ee   :  { %v975_v24 = vadd.f32 %v973_v20, %v1842_v5 }
0x11ef   :  { %v1420_v18 = vmul.f32 -1.442695, %v976_v23 }
0x11f0   :  { %v1418_v25 = vmul.f32 -1.442695, %v975_v24 }
0x11f1   :  { %1690 = vpow2.f32 %v1420_v18 }
0x11f2   :  { %1692 = vpow2.f32 %v1418_v25 }
0x11fb   :  { %v1691_v28 = vpop.eup %1690 }
0x11fc   :  { %v1693_v29 = vpop.eup %1692  ;;  %v1008_v30 = vadd.f32 1.0, %v1691_v28 }
0x11fd   :  { %v980_v31 = vadd.f32 1.0, %v1693_v29 }
0x11fe   :  { %1694 = vrcp.f32 %v1008_v30  ;;  %v1775_v30 = vmov 0.0|0.0  }
0x11ff   :  { %1696 = vrcp.f32 %v980_v31  ;;  %1596 = vmatprep.subr.bf16.mxu0 %v1775_v30  ;;  %1608 = vmatprep.subr.bf16.mxu1 %v1775_v30 }
0x1200   :  { %1598 = vmatpush3.bf16.msra.mxu0 %v1852_v22 }
0x1201   :  { %1599 = vmatprep.subr.bf16.mxu0 %v1775_v30 }
0x1204   :  { %1601 = vmatpush3.bf16.msra.mxu0 %v1856_v27 }
0x1205   :  { %1602 = vmatprep.subr.bf16.mxu0 %v1775_v30 }
0x1208   :  { %v1695_v34 = vpop.eup %1694  ;;  %1604 = vmatpush3.bf16.msra.mxu0 %v1865_v33 }
0x1209   :  { %v1697_v35 = vpop.eup %1696  ;;  %v1011_v7 = vmul.f32 2.0, %v1695_v34  ;;  %v1013_v26 = vmul.f32 %v1695_v34, %v880_v2  ;;  %1605 = vmatprep.subr.bf16.mxu0 %v1775_v30 }
0x120a   :  { %v983_v36 = vmul.f32 2.0, %v1697_v35  ;;  %v988_v50 = vmul.f32 %v1697_v35, %v986_v47 }
0x120b   :  { %v1421_v37 = vadd.f32 -1.0, %v1011_v7 }
0x120c   :  { %v1419_v40 = vadd.f32 -1.0, %v983_v36  ;;  %1607 = vmatpush3.bf16.msra.mxu0 %v1873_v39 }
0x120d   :  { %1015 = vrot.lane.b32.xlu0 %v1421_v37, %s1771_s0 }
0x120e   :  { %990 = vrot.lane.b32.xlu1 %v1419_v40, %s1771_s0 }
0x127f   :  { %v1016_v41 = vpop.permute.xlu0 %1015 }
0x1280   :  { %v1018_v42 = vmul.f32 %v1695_v34, %v1016_v41  ;;  %v991_v45 = vpop.permute.xlu1 %990 }
0x1281   :  { %v993_v46 = vmul.f32 %v1697_v35, %v991_v45 }
0x1282   :  { %1020 = vrot.lane.b32.xlu0 %v1018_v42, %s1771_s0 }
0x1283   :  { %995 = vrot.lane.b32.xlu1 %v993_v46, %s1771_s0 }
0x12f4   :  { %v1021_v48 = vpop.permute.xlu0 %1020 }
0x12f5   :  { %v1023_v32 = vadd.f32 %v1021_v48, %v1013_v26  ;;  %v996_v51 = vpop.permute.xlu1 %995 }
0x12f6   :  { %v998_v52 = vadd.f32 %v996_v51, %v988_v50 }
0x12f7   :  { %1698 = vtanh.f32 %v1023_v32 }
0x12f8   :  { %1700 = vtanh.f32 %v998_v52  ;;  %v1129_v21 = vrot.slane %v998_v52, 6 }
0x1301   :  { %v1699_v53 = vpop.eup %1698 }
0x1302   :  { %v1701_v38 = vpop.eup %1700  ;;  %1026 = vrot.lane.b32.xlu0 %v1699_v53, %s1771_s0 }
0x1303   :  { %1001 = vrot.lane.b32.xlu1 %v1701_v38, %s1771_s0 }
0x1374   :  { %v1027_v54 = vpop.permute.xlu0 %1026 }
0x1375   :  { %v1029_v43 = vmul.f32 %v1695_v34, %v1027_v54  ;;  %v1002_v55 = vpop.permute.xlu1 %1001  ;;  %v1284_v54 = vld [vmem:[%s2069_s5 + $0x8] sm:$0xff] }
0x1376   :  { %v1004_v56 = vmul.f32 %v1697_v35, %v1002_v55 }
0x1377   :  { %v1035_v57 = vrot.slane %v1029_v43, 4  ;;  %v1285_v43 = vld [vmem:[%s2069_s5 + $0x10] sm:$0xff] }
0x1378   :  { %1031 = vrot.lane.b32.xlu0 %v1004_v56, %s1773_s1  ;;  %v1286_v56 = vld [vmem:[%s2069_s5 + $0x18] sm:$0xff] }
0x1379   :  { %1036 = vrot.lane.b32.xlu1 %v1035_v57, %s1774_s4  ;;  %v1612_v57 = vpack.c.bf16 %v1286_v56, %v1285_v43 }
0x13ea   :  { %v1032_v58 = vpop.permute.xlu0 %1031 }
0x13eb   :  { %v1037_v59 = vpop.permute.xlu1 %1036 }
0x13ec   :  { %v1039_v60 = vsel %vm185_vm1, %v1032_v58, %v1037_v59 }
0x13ed   :  { %v1041_v61 = vrot.slane %v1039_v60, 4 }
0x13ef   :  { %1422 = vmatmul.mubr.msk.f32.vlgmr.msra.gmra.mrb[6].mxu1 %vm187_vm2, %v1041_v61 }
0x13f0   :  { %1481 = vmatprep.mubr.msk.f32.mxu1 %vm1776_vm3, %v1772_v44 }
0x14c2   :  { %v1110_v62 = vpop.f32.mrb[6].mxu1 }
0x14c3   :  { %v1116_v63 = vrot.slane %v1110_v62, 2  ;;  %v1112_v0 = vpop.f32.mrb[7].mxu1  ;;  %v1430_v62 = vld [vmem:[%s2070_s6] ss:$0 sm:$0xff] }
0x14c4   :  { %v1119_v1 = vadd.f32 %v1904_v49, %v1112_v0 }
0x14c5   :  { %v1118_v2 = vadd.f32 %v1116_v63, %v1842_v5 }
0x14c6   :  { %v1425_v3 = vmul.f32 -1.442695, %v1119_v1 }
0x14c7   :  { %v1423_v4 = vmul.f32 -1.442695, %v1118_v2 }
0x14c8   :  { %1702 = vpow2.f32 %v1425_v3 }
0x14c9   :  { %1704 = vpow2.f32 %v1423_v4 }
0x14d2   :  { %v1703_v6 = vpop.eup %1702 }
0x14d3   :  { %v1705_v8 = vpop.eup %1704  ;;  %v1151_v9 = vadd.f32 1.0, %v1703_v6 }
0x14d4   :  { %v1123_v10 = vadd.f32 1.0, %v1705_v8 }
0x14d5   :  { %1706 = vrcp.f32 %v1151_v9 }
0x14d6   :  { %1708 = vrcp.f32 %v1123_v10 }
0x14df   :  { %v1707_v11 = vpop.eup %1706 }
0x14e0   :  { %v1709_v12 = vpop.eup %1708  ;;  %v1154_v13 = vmul.f32 2.0, %v1707_v11  ;;  %v1156_v23 = vmul.f32 %v1707_v11, %v1023_v32 }
0x14e1   :  { %v1126_v14 = vmul.f32 2.0, %v1709_v12  ;;  %v1131_v18 = vmul.f32 %v1709_v12, %v1129_v21 }
0x14e2   :  { %v1426_v15 = vadd.f32 -1.0, %v1154_v13 }
0x14e3   :  { %v1424_v16 = vadd.f32 -1.0, %v1126_v14 }
0x14e4   :  { %1158 = vrot.lane.b32.xlu0 %v1426_v15, %s1771_s0 }
0x14e5   :  { %1133 = vrot.lane.b32.xlu1 %v1424_v16, %s1771_s0 }
0x1556   :  { %v1159_v5 = vpop.permute.xlu0 %1158 }
0x1557   :  { %v1161_v17 = vmul.f32 %v1707_v11, %v1159_v5  ;;  %v1134_v19 = vpop.permute.xlu1 %1133 }
0x1558   :  { %v1136_v20 = vmul.f32 %v1709_v12, %v1134_v19 }
0x1559   :  { %1163 = vrot.lane.b32.xlu0 %v1161_v17, %s1771_s0 }
0x155a   :  { %1138 = vrot.lane.b32.xlu1 %v1136_v20, %s1771_s0 }
0x15cb   :  { %v1164_v24 = vpop.permute.xlu0 %1163 }
0x15cc   :  { %v1166_v25 = vadd.f32 %v1164_v24, %v1156_v23  ;;  %v1139_v28 = vpop.permute.xlu1 %1138 }
0x15cd   :  { %v1141_v29 = vadd.f32 %v1139_v28, %v1131_v18 }
0x15ce   :  { %1710 = vtanh.f32 %v1166_v25 }
0x15cf   :  { %1712 = vtanh.f32 %v1141_v29 }
0x15d8   :  { %v1711_v31 = vpop.eup %1710 }
0x15d9   :  { %v1713_v34 = vpop.eup %1712  ;;  %1169 = vrot.lane.b32.xlu0 %v1711_v31, %s1771_s0 }
0x15da   :  { %1144 = vrot.lane.b32.xlu1 %v1713_v34, %s1771_s0 }
0x164b   :  { %v1170_v22 = vpop.permute.xlu0 %1169 }
0x164c   :  { %v1172_v35 = vmul.f32 %v1707_v11, %v1170_v22  ;;  %v1145_v27 = vpop.permute.xlu1 %1144 }
0x164d   :  { %v1147_v7 = vmul.f32 %v1709_v12, %v1145_v27 }
0x164e   :  { %v1178_v36 = vrot.slane %v1172_v35, 2 }
0x164f   :  { %1174 = vrot.lane.b32.xlu0 %v1147_v7, %s1773_s1 }
0x1650   :  { %1179 = vrot.lane.b32.xlu1 %v1178_v36, %s1774_s4 }
0x16c1   :  { %v1175_v37 = vpop.permute.xlu0 %1174 }
0x16c2   :  { %v1180_v40 = vpop.permute.xlu1 %1179 }
0x16c3   :  { %v1182_v33 = vsel %vm185_vm1, %v1175_v37, %v1180_v40 }
0x16c4   :  { %v1184_v41 = vrot.slane %v1182_v33, 6 }
0x16c6   :  { %1471 = vmatmul.mubr.msk.f32.vlgmr.msra.gmra.mrb[8].mxu0 %vm187_vm2, %v1184_v41 }
0x1799   :  { %v1253_v39 = vpop.f32.mrb[8].mxu0 }
0x179a   :  { %v1257_v42 = vadd.f32 %v1904_v49, %v1253_v39  ;;  %v1472_v44 = vpop.f32.mrb[9].mxu0  ;;  %v1283_v49 = vld [vmem:[%s2069_s5] sm:$0xff]  ;;  %s1377_s5 = sshll.u32 %s1777_s10, 4  ;;  %s1378_s5 = int_to_ptr.vmem [resolvable:$true] %s1377_s5 }
0x179b   :  { %v1609_v55 = vpack.c.bf16 %v1284_v54, %v1283_v49  ;;  %s1742_s11 = scalar_lea.vmem %s1378_s5, 32  ;;  %p1747_p9 = scmp.lt.s32.totalorder %s1378_s5, %s1378_s5 }
0x179c   :  { %v1428_v45 = vmul.f32 -1.442695, %v1257_v42  ;;  %p1743_p8 = scmp.ne.s32.totalorder %s1378_s5, %s1742_s11  ;;  %p1748_p10 = scmp.lt.s32.totalorder %s1742_s11, %s1742_s11 }
0x179d   :  { %1610 = vmatpush3.bf16.msra.mxu1 %v1609_v55 }
0x179e   :  { %1714 = vpow2.f32 %v1428_v45  ;;  %1611 = vmatprep.subr.bf16.mxu1 %v1775_v30  ;;  %p1749_p11 = por %p1748_p10, %p1747_p9 }
0x17a0   :  { %p1750_p12 = pnand %p1749_p11, %p1743_p8 }
0x17a1   :  { %1613 = vmatpush3.bf16.msra.mxu1 %v1612_v57 }
0x17a8   :  { %v1715_v46 = vpop.eup %1714 }
0x17a9   :  { %v1261_v47 = vadd.f32 1.0, %v1715_v46 }
0x17ab   :  { %1716 = vrcp.f32 %v1261_v47 }
0x17b5   :  { %v1717_v26 = vpop.eup %1716 }
0x17b6   :  { %v1264_v48 = vmul.f32 2.0, %v1717_v26  ;;  %v1266_v52 = vmul.f32 %v1717_v26, %v1166_v25 }
0x17b8   :  { %v1429_v50 = vadd.f32 -1.0, %v1264_v48 }
0x17ba   :  { %1268 = vrot.lane.b32.xlu0 %v1429_v50, %s1771_s0 }
0x182c   :  { %v1269_v32 = vpop.permute.xlu0 %1268 }
0x182d   :  { %v1271_v51 = vmul.f32 %v1717_v26, %v1269_v32 }
0x182f   :  { %1273 = vrot.lane.b32.xlu1 %v1271_v51, %s1771_s0 }
0x18a1   :  { %v1274_v53 = vpop.permute.xlu1 %1273 }
0x18a2   :  { %v1276_v38 = vadd.f32 %v1274_v53, %v1266_v52 }
0x18a4   :  { %1718 = vtanh.f32 %v1276_v38 }
0x18ae   :  { %v1719_v58 = vpop.eup %1718 }
0x18af   :  { %1279 = vrot.lane.b32.xlu0 %v1719_v58, %s1771_s0 }
0x1921   :  { %v1280_v59 = vpop.permute.xlu0 %1279 }
0x1922   :  { %v1282_v60 = vmul.f32 %v1717_v26, %v1280_v59 }
0x1924   :  { %1295 = vrot.lane.b32.xlu1 %v1282_v60, %s1773_s1 }
0x1996   :  { %v1296_v61 = vpop.permute.xlu1 %1295 }
0x1997   :  { %1482 = vmatmul.mubr.msk.f32.vlgmr.msra.gmra.mrb[8].mxu1 %vm185_vm1, %v1296_v61 }
0x1a6a   :  { %v1365_v63 = vpop.f32.mrb[8].mxu1 }
0x1a6b   :  { %v1366_v0 = vadd.f32 %v1430_v62, %v1365_v63  ;;  %v1483_v1 = vpop.f32.mrb[9].mxu1 }
0x1a6d   :  { %1370 = vst.msk [vmem:[#allocation5] sm:$0x3] %vm1369_vm4, %v1366_v0 }
0x1a6e   :  { %1753 = shalt.err (!%p1750_p12)
}
0x1a6f   :  { %s1754_s14 = scalar_lea.hbm %s2071_s7, 32 }
0x1a70   :  { %p1755_p13 = scmp.ne.s32.totalorder %s2071_s7, %s1754_s14  ;;  %p1758_p0 = scmp.lt.u32.totalorder %s1754_s14, %s2071_s7 }
0x1a72   :  { %p1760_p1 = pnand %p1758_p0, %p1755_p13 }
0x1a74   :  { %1763 = shalt.err (!%p1760_p1)
}
0x1a75   :  { %1380 = dma.vmem_to_hbm [thread:$0]  %s1378_s5, 32, %s2071_s7, [#allocation4]  }
0x1a76   :  { %1766 = dma.done.wait [#allocation4], 32  }
0x1a77   :  { %1767 = vsyncadd [#allocation4], 4294967264 }
0x1a78   :  { %1384 = vsyncpa [#allocation3], 1 }
0x1a79   :  { %1385 = vsyncpa [#allocation4], 1 }

</bundles_post_ra>
